<compile_context>
chip_gen: v7x
topology: tpu7x:2x2x1
jax: 0.10.0
libtpu: 0.0.40
codegen_flags: <defaults>
</compile_context>

<pallas_src>
import functools

import jax
import jax.numpy as jnp
from jax.experimental import pallas as pl
from jax.experimental.pallas import tpu as pltpu


# ----------------------------- tiling helpers --------------------------------

def _default_row_tile():
    try:
        kind = jax.devices()[0].device_kind.lower()
    except Exception:
        return 256
    if "v5 lite" in kind or "v5e" in kind or "v5lite" in kind:
        return 128          # v5e: 128x128 MXU granularity
    return 256              # v6e / v7x: 256-wide MXU


_ROW_TILE = _default_row_tile()   # sublane (row) tile for [B*S, D] slabs
_COL_TILE = 512                   # lane tile for tiled contraction / output dims
_LN_EPS = 1e-12


def _round_up(a, b):
    return (a + b - 1) // b * b


def _row_tile(m):
    if m <= _ROW_TILE:
        return _round_up(m, 8)
    return _ROW_TILE


def _pad_rows(x, tm):
    m = x.shape[0]
    mp = _round_up(m, tm)
    if mp != m:
        x = jnp.pad(x, ((0, mp - m), (0, 0)))
    return x, m


def _dim_tiling(d, pref=_COL_TILE):
    """(tile, padded_dim) for a lane/contraction dimension."""
    if d <= pref:
        return d, d                       # full-extent block (always legal)
    if d % pref == 0:
        return pref, d
    if d % 256 == 0:
        return 256, d
    if d % 128 == 0:
        return 128, d
    return pref, _round_up(d, pref)


def _layernorm(y, g, b):
    mu = jnp.mean(y, axis=-1, keepdims=True)
    var = jnp.mean(jnp.square(y - mu), axis=-1, keepdims=True)
    return (y - mu) * jax.lax.rsqrt(var + _LN_EPS) * g + b


def _gelu(h):
    # tanh approximation (matches common BERT impls); f32 math
    return 0.5 * h * (1.0 + jnp.tanh(0.7978845608028654 * (h + 0.044715 * h * h * h)))


# ----------------------------- Pallas kernels --------------------------------

def _linear_acc_kernel(x_ref, w_ref, b_ref, o_ref, acc_ref):
    """o[i,j] = sum_k x[i,k] @ w[k,j] + b[j]; K-tiled with an f32 accumulator."""
    k = pl.program_id(2)

    @pl.when(k == 0)
    def _():
        acc_ref[...] = jnp.zeros_like(acc_ref)

    acc_ref[...] += jnp.dot(
        x_ref[...].astype(jnp.bfloat16), w_ref[...],
        preferred_element_type=jnp.float32)

    @pl.when(k == pl.num_programs(2) - 1)
    def _():
        o_ref[...] = acc_ref[...] + b_ref[...]


def _attention_kernel(qkv_ref, keep_ref, o_ref, *, n_heads, d_head, scale):
    """All heads of one batch element; heads sliced lane-wise from [S, 3D]."""
    d_model = n_heads * d_head
    qkv = qkv_ref[0]                                    # (S, 3D) f32
    keep = keep_ref[0]                                  # (1, S)  f32, 1 = attend
    bias = jnp.where(keep > 0.0, 0.0, -1e9)             # additive key mask

    outs = []
    for h in range(n_heads):
        lo = h * d_head
        q = qkv[:, lo:lo + d_head].astype(jnp.bfloat16)
        k = qkv[:, d_model + lo:d_model + lo + d_head].astype(jnp.bfloat16)
        v = qkv[:, 2 * d_model + lo:2 * d_model + lo + d_head].astype(jnp.bfloat16)
        s = jax.lax.dot_general(
            q, k, (((1,), (1,)), ((), ())),
            preferred_element_type=jnp.float32) * scale
        s = s + bias
        s = s - jnp.max(s, axis=-1, keepdims=True)
        p = jnp.exp(s)
        p = p * pl.reciprocal(jnp.sum(p, axis=-1, keepdims=True), approx=True)
        outs.append(jnp.dot(p.astype(jnp.bfloat16), v,
                            preferred_element_type=jnp.float32))
    o_ref[0] = jnp.concatenate(outs, axis=-1)           # lane-dense (S, D) store


def _proj_add_ln_kernel(a_ref, w_ref, b_ref, r_ref, g_ref, be_ref, o_ref):
    """LayerNorm(residual + attn @ Wo + bo)."""
    y = jnp.dot(a_ref[...].astype(jnp.bfloat16), w_ref[...],
                preferred_element_type=jnp.float32) + b_ref[...] + r_ref[...]
    o_ref[...] = _layernorm(y, g_ref[...], be_ref[...])


def _ffn_add_ln_kernel(x_ref, w1_ref, b1_ref, w2_ref, b2_ref, g_ref, be_ref,
                       o_ref, acc_ref):
    """LayerNorm(x + GELU(x @ W1 + b1) @ W2 + b2), tiled over d_ff."""
    f = pl.program_id(1)

    @pl.when(f == 0)
    def _():
        acc_ref[...] = jnp.zeros_like(acc_ref)

    h = jnp.dot(x_ref[...].astype(jnp.bfloat16), w1_ref[...],
                preferred_element_type=jnp.float32) + b1_ref[...]
    g = _gelu(h)
    acc_ref[...] += jnp.dot(g.astype(jnp.bfloat16), w2_ref[...],
                            preferred_element_type=jnp.float32)

    @pl.when(f == pl.num_programs(1) - 1)
    def _():
        y = acc_ref[...] + b2_ref[...] + x_ref[...]
        o_ref[...] = _layernorm(y, g_ref[...], be_ref[...])


def _linear_lse_kernel(x_ref, w_ref, b_ref, logits_ref, lse_ref,
                       acc_ref, m_ref, l_ref):
    """Vocab/K-tiled logits + online max/LSE accumulator across the vocab axis."""
    j = pl.program_id(1)
    k = pl.program_id(2)
    nj = pl.num_programs(1)
    nk = pl.num_programs(2)

    @pl.when(jnp.logical_and(j == 0, k == 0))
    def _():
        m_ref[...] = jnp.full(m_ref.shape, -jnp.inf, dtype=jnp.float32)
        l_ref[...] = jnp.zeros(l_ref.shape, dtype=jnp.float32)

    @pl.when(k == 0)
    def _():
        acc_ref[...] = jnp.zeros_like(acc_ref)

    acc_ref[...] += jnp.dot(
        x_ref[...].astype(jnp.bfloat16), w_ref[...],
        preferred_element_type=jnp.float32)

    @pl.when(k == nk - 1)
    def _():
        logits = acc_ref[...] + b_ref[...]
        logits_ref[...] = logits
        m_prev = m_ref[...]
        m_new = jnp.maximum(m_prev, jnp.max(logits, axis=-1, keepdims=True))
        l_ref[...] = l_ref[...] * jnp.exp(m_prev - m_new) + jnp.sum(
            jnp.exp(logits - m_new), axis=-1, keepdims=True)
        m_ref[...] = m_new

    @pl.when(jnp.logical_and(j == nj - 1, k == nk - 1))
    def _():
        lse_ref[...] = m_ref[...] + jnp.log(l_ref[...])


def _sub_lse_kernel(logits_ref, lse_ref, o_ref):
    o_ref[...] = logits_ref[...] - lse_ref[...]


# ----------------------------- kernel wrappers --------------------------------

def linear(x, w, b):
    """x[M,K] @ w[K,N] + b, row/K/N tiled, bf16 MXU inputs, f32 accumulation."""
    M, K = x.shape
    N = w.shape[1]
    tm = _row_tile(M)
    xp, m0 = _pad_rows(x, tm)
    Mp = xp.shape[0]
    tk, Kp = _dim_tiling(K)
    tn, Np = _dim_tiling(N)
    if Kp != K:
        xp = jnp.pad(xp, ((0, 0), (0, Kp - K)))
        w = jnp.pad(w, ((0, Kp - K), (0, 0)))
    if Np != N:
        w = jnp.pad(w, ((0, 0), (0, Np - N)))
        b = jnp.pad(b, (0, Np - N))
    out = pl.pallas_call(
        _linear_acc_kernel,
        out_shape=jax.ShapeDtypeStruct((Mp, Np), jnp.float32),
        grid=(Mp // tm, Np // tn, Kp // tk),
        in_specs=[
            pl.BlockSpec((tm, tk), lambda i, j, k: (i, k)),
            pl.BlockSpec((tk, tn), lambda i, j, k: (k, j)),
            pl.BlockSpec((1, tn), lambda i, j, k: (0, j)),
        ],
        out_specs=pl.BlockSpec((tm, tn), lambda i, j, k: (i, j)),
        scratch_shapes=[pltpu.VMEM((tm, tn), jnp.float32)],
        compiler_params=pltpu.CompilerParams(
            dimension_semantics=("parallel", "parallel", "arbitrary")),
    )(xp, w, b.reshape(1, Np))
    return out[:m0, :N]


def attention(qkv, key_keep, n_heads):
    """qkv: [B, S, 3D] (Q|K|V along lanes), key_keep: [B, 1, S]."""
    B, S, three_d = qkv.shape
    D = three_d // 3
    Dh = D // n_heads
    kernel = functools.partial(_attention_kernel, n_heads=n_heads, d_head=Dh,
                               scale=1.0 / (Dh ** 0.5))
    return pl.pallas_call(
        kernel,
        out_shape=jax.ShapeDtypeStruct((B, S, D), jnp.float32),
        grid=(B,),
        in_specs=[
            pl.BlockSpec((1, S, three_d), lambda b: (b, 0, 0)),
            pl.BlockSpec((1, 1, S), lambda b: (b, 0, 0)),
        ],
        out_specs=pl.BlockSpec((1, S, D), lambda b: (b, 0, 0)),
        compiler_params=pltpu.CompilerParams(dimension_semantics=("parallel",)),
    )(qkv, key_keep)


def proj_add_layernorm(a, w, b, resid, gamma, beta):
    M, D = a.shape
    tm = _row_tile(M)
    ap, m0 = _pad_rows(a, tm)
    rp, _ = _pad_rows(resid, tm)
    Mp = ap.shape[0]
    out = pl.pallas_call(
        _proj_add_ln_kernel,
        out_shape=jax.ShapeDtypeStruct((Mp, D), jnp.float32),
        grid=(Mp // tm,),
        in_specs=[
            pl.BlockSpec((tm, D), lambda i: (i, 0)),
            pl.BlockSpec((D, D), lambda i: (0, 0)),
            pl.BlockSpec((1, D), lambda i: (0, 0)),
            pl.BlockSpec((tm, D), lambda i: (i, 0)),
            pl.BlockSpec((1, D), lambda i: (0, 0)),
            pl.BlockSpec((1, D), lambda i: (0, 0)),
        ],
        out_specs=pl.BlockSpec((tm, D), lambda i: (i, 0)),
        compiler_params=pltpu.CompilerParams(dimension_semantics=("parallel",)),
    )(ap, w, b.reshape(1, D), rp, gamma.reshape(1, D), beta.reshape(1, D))
    return out[:m0]


def ffn_add_layernorm(x, w1, b1, w2, b2, gamma, beta):
    M, D = x.shape
    F = w1.shape[1]
    tm = _row_tile(M)
    xp, m0 = _pad_rows(x, tm)
    Mp = xp.shape[0]
    tf, Fp = _dim_tiling(F)
    if Fp != F:
        w1 = jnp.pad(w1, ((0, 0), (0, Fp - F)))
        b1 = jnp.pad(b1, (0, Fp - F))
        w2 = jnp.pad(w2, ((0, Fp - F), (0, 0)))
    out = pl.pallas_call(
        _ffn_add_ln_kernel,
        out_shape=jax.ShapeDtypeStruct((Mp, D), jnp.float32),
        grid=(Mp // tm, Fp // tf),
        in_specs=[
            pl.BlockSpec((tm, D), lambda i, f: (i, 0)),
            pl.BlockSpec((D, tf), lambda i, f: (0, f)),
            pl.BlockSpec((1, tf), lambda i, f: (0, f)),
            pl.BlockSpec((tf, D), lambda i, f: (f, 0)),
            pl.BlockSpec((1, D), lambda i, f: (0, 0)),
            pl.BlockSpec((1, D), lambda i, f: (0, 0)),
            pl.BlockSpec((1, D), lambda i, f: (0, 0)),
        ],
        out_specs=pl.BlockSpec((tm, D), lambda i, f: (i, 0)),
        scratch_shapes=[pltpu.VMEM((tm, D), jnp.float32)],
        compiler_params=pltpu.CompilerParams(
            dimension_semantics=("parallel", "arbitrary")),
    )(xp, w1, b1.reshape(1, Fp), w2, b2.reshape(1, D),
      gamma.reshape(1, D), beta.reshape(1, D))
    return out[:m0]


def linear_log_softmax(x, w, b):
    """log_softmax(x @ w + b) with vocab + contraction tiling (online LSE)."""
    M, K = x.shape
    N = w.shape[1]
    tm = _row_tile(M)
    xp, m0 = _pad_rows(x, tm)
    Mp = xp.shape[0]
    tk, Kp = _dim_tiling(K)
    tn, Np = _dim_tiling(N)
    if Kp != K:
        xp = jnp.pad(xp, ((0, 0), (0, Kp - K)))
        w = jnp.pad(w, ((0, Kp - K), (0, 0)))
    if Np != N:
        w = jnp.pad(w, ((0, 0), (0, Np - N)))
        # padded vocab columns get a -1e30 bias so they vanish from the LSE
        b = jnp.pad(b, (0, Np - N), constant_values=-1e30)

    logits, lse = pl.pallas_call(
        _linear_lse_kernel,
        out_shape=(jax.ShapeDtypeStruct((Mp, Np), jnp.float32),
                   jax.ShapeDtypeStruct((Mp, 1), jnp.float32)),
        grid=(Mp // tm, Np // tn, Kp // tk),
        in_specs=[
            pl.BlockSpec((tm, tk), lambda i, j, k: (i, k)),
            pl.BlockSpec((tk, tn), lambda i, j, k: (k, j)),
            pl.BlockSpec((1, tn), lambda i, j, k: (0, j)),
        ],
        out_specs=(pl.BlockSpec((tm, tn), lambda i, j, k: (i, j)),
                   pl.BlockSpec((tm, 1), lambda i, j, k: (i, 0))),
        scratch_shapes=[pltpu.VMEM((tm, tn), jnp.float32),
                        pltpu.VMEM((tm, 1), jnp.float32),
                        pltpu.VMEM((tm, 1), jnp.float32)],
        compiler_params=pltpu.CompilerParams(
            dimension_semantics=("parallel", "arbitrary", "arbitrary")),
    )(xp, w, b.reshape(1, Np))

    out = pl.pallas_call(
        _sub_lse_kernel,
        out_shape=jax.ShapeDtypeStruct((Mp, Np), jnp.float32),
        grid=(Mp // tm, Np // tn),
        in_specs=[pl.BlockSpec((tm, tn), lambda i, j: (i, j)),
                  pl.BlockSpec((tm, 1), lambda i, j: (i, 0))],
        out_specs=pl.BlockSpec((tm, tn), lambda i, j: (i, j)),
        compiler_params=pltpu.CompilerParams(
            dimension_semantics=("parallel", "parallel")),
    )(logits, lse)
    return out[:m0, :N]


def nsp_head(x_cls, w, b):
    # (B, D) x (D, 2): 2-wide lane output cannot use the MXU -> plain JAX glue.
    logits = x_cls @ w + b
    z = logits - jnp.max(logits, axis=-1, keepdims=True)
    return z - jnp.log(jnp.sum(jnp.exp(z), axis=-1, keepdims=True))


# ----------------------------- parameter init --------------------------------

def init_params(key, *, vocab_size, d_model, n_layers, n_heads, d_ff, max_len):
    def dense(k, shape, dtype=jnp.bfloat16):
        return (jax.random.normal(k, shape, jnp.float32) * 0.02).astype(dtype)

    keys = jax.random.split(key, 5 + n_layers)
    params = {
        "tok_emb": dense(keys[0], (vocab_size, d_model), jnp.float32),
        "seg_emb": dense(keys[1], (2, d_model), jnp.float32),
        "pos_emb": dense(keys[2], (max_len, d_model), jnp.float32),
        "nsp_w": dense(keys[3], (d_model, 2), jnp.float32),
        "nsp_b": jnp.zeros((2,), jnp.float32),
        "mlm_w": dense(keys[4], (d_model, vocab_size)),          # bf16 (MXU input)
        "mlm_b": jnp.zeros((vocab_size,), jnp.float32),
        "layers": [],
    }
    for li in range(n_layers):
        lk = jax.random.split(keys[5 + li], 4)
        layer = {
            "w_qkv": dense(lk[0], (d_model, 3 * d_model)),       # fused Q|K|V
            "b_qkv": jnp.zeros((3 * d_model,), jnp.float32),
            "wo": dense(lk[1], (d_model, d_model)),
            "bo": jnp.zeros((d_model,), jnp.float32),
            "w1": dense(lk[2], (d_model, d_ff)),
            "b1": jnp.zeros((d_ff,), jnp.float32),
            "w2": dense(lk[3], (d_ff, d_model)),
            "b2": jnp.zeros((d_model,), jnp.float32),
            "ln1_g": jnp.ones((d_model,), jnp.float32),
            "ln1_b": jnp.zeros((d_model,), jnp.float32),
            "ln2_g": jnp.ones((d_model,), jnp.float32),
            "ln2_b": jnp.zeros((d_model,), jnp.float32),
        }
        params["layers"].append(layer)
    return params


# ----------------------------- model forward ---------------------------------

def bert_encoder(params, token_ids, token_type_ids, *, n_heads):
    B, S = token_ids.shape
    D = params["tok_emb"].shape[1]

    # embedding gather + sum (plain JAX glue)
    x = (
        params["tok_emb"][token_ids]
        + params["seg_emb"][token_type_ids]
        + params["pos_emb"][:S][None, :, :]
    )  # [B, S, D]

    # key-keep vector (no (B, S, S) mask is ever materialized)
    key_keep = (token_ids > 0).astype(jnp.float32)[:, None, :]  # [B, 1, S]

    x2 = x.reshape(B * S, D)

    for layer in params["layers"]:
        qkv = linear(x2, layer["w_qkv"], layer["b_qkv"])         # [B*S, 3D]
        attn = attention(qkv.reshape(B, S, 3 * D), key_keep, n_heads)  # [B, S, D]
        x2 = proj_add_layernorm(attn.reshape(B * S, D), layer["wo"], layer["bo"],
                                x2, layer["ln1_g"], layer["ln1_b"])
        x2 = ffn_add_layernorm(x2, layer["w1"], layer["b1"], layer["w2"],
                               layer["b2"], layer["ln2_g"], layer["ln2_b"])

    return x2.reshape(B, S, D)


def bert_lm_forward(params, token_ids, token_type_ids=None, *, n_heads):
    B, S = token_ids.shape
    if token_type_ids is None:
        token_type_ids = jnp.zeros_like(token_ids)
    D = params["tok_emb"].shape[1]
    V = params["mlm_w"].shape[1]

    x = bert_encoder(params, token_ids, token_type_ids, n_heads=n_heads)  # [B,S,D]

    # NextSentencePrediction: log_softmax(linear(x[:, 0]))
    nsp = nsp_head(x[:, 0, :], params["nsp_w"], params["nsp_b"])          # [B, 2]

    # MaskedLanguageModel: log_softmax(linear(x)) over vocab (tiled Pallas head)
    mlm = linear_log_softmax(
        x.reshape(B * S, D), params["mlm_w"], params["mlm_b"]
    ).reshape(B, S, V)

    return nsp, mlm


# TODO(synk): dropout layers are identity (eval mode); embedding gather and the
# tiny NSP head stay in plain JAX (no efficient Pallas/MXU mapping).


if __name__ == "__main__":
    B, S, D, H, L, FF, V = 2, 8, 32, 2, 2, 64, 100

    key = jax.random.PRNGKey(0)
    pk, xk = jax.random.split(key, 2)

    params = init_params(
        pk, vocab_size=V, d_model=D, n_layers=L, n_heads=H, d_ff=FF, max_len=S
    )

    token_ids = jax.random.randint(xk, (B, S), 1, V, dtype=jnp.int32)
    token_ids = token_ids.at[1, -2:].set(0)  # some padding to exercise the mask
    token_type_ids = jnp.concatenate(
        [jnp.zeros((B, S // 2), jnp.int32), jnp.ones((B, S - S // 2), jnp.int32)],
        axis=1,
    )

    fwd = jax.jit(functools.partial(bert_lm_forward, n_heads=H))
    nsp_out, mlm_out = fwd(params, token_ids, token_type_ids)
    jax.block_until_ready((nsp_out, mlm_out))

    assert nsp_out.shape == (B, 2), nsp_out.shape
    assert mlm_out.shape == (B, S, V), mlm_out.shape
    assert bool(jnp.all(jnp.isfinite(nsp_out)))
    assert bool(jnp.all(jnp.isfinite(mlm_out)))
    # log-softmax sanity: rows sum to 1 in prob space
    assert jnp.allclose(jnp.exp(nsp_out).sum(-1), 1.0, atol=1e-4)
    assert jnp.allclose(jnp.exp(mlm_out).sum(-1), 1.0, atol=1e-4)

    print("KERNEL_OK")
</pallas_src>

<mosaic_0001>
module attributes {stable_mosaic.version = 11 : i64} {
  func.func @_attention_kernel(%arg0: i32, %arg1: memref<1x8x96xf32, #tpu.memory_space<vmem>>, %arg2: memref<1x1x8xf32, #tpu.memory_space<vmem>>, %arg3: memref<1x8x32xf32, #tpu.memory_space<vmem>>) attributes {dimension_semantics = [#tpu.dimension_semantics<parallel>], iteration_bounds = array<i64: 2>, scalar_prefetch = 0 : i64, scratch_operands = 0 : i64, tpu.core_type = #tpu.core_type<tc>, window_params = [{transform_indices = @transform_0, window_bounds = array<i64: 1, 8, 96>}, {transform_indices = @transform_1, window_bounds = array<i64: 1, 1, 8>}, {transform_indices = @transform_2, window_bounds = array<i64: 1, 8, 32>}]} {
    %c0 = arith.constant 0 : index
    %c0_0 = arith.constant 0 : index
    %c0_1 = arith.constant 0 : index
    %0 = vector.load %arg1[%c0, %c0_0, %c0_1] : memref<1x8x96xf32, #tpu.memory_space<vmem>>, vector<1x8x96xf32>
    %1 = vector.shape_cast %0 : vector<1x8x96xf32> to vector<8x96xf32>
    %c0_2 = arith.constant 0 : index
    %c0_3 = arith.constant 0 : index
    %c0_4 = arith.constant 0 : index
    %2 = vector.load %arg2[%c0_2, %c0_3, %c0_4] : memref<1x1x8xf32, #tpu.memory_space<vmem>>, vector<1x1x8xf32>
    %3 = vector.shape_cast %2 : vector<1x1x8xf32> to vector<1x8xf32>
    %cst = arith.constant 0.000000e+00 : f32
    %4 = vector.broadcast %cst : f32 to vector<1x8xf32>
    %5 = arith.cmpf ogt, %3, %4 : vector<1x8xf32>
    %cst_5 = arith.constant 0.000000e+00 : f32
    %cst_6 = arith.constant -1.000000e+09 : f32
    %6 = vector.broadcast %cst_5 : f32 to vector<1x8xf32>
    %7 = vector.broadcast %cst_6 : f32 to vector<1x8xf32>
    %8 = arith.select %5, %6, %7 : vector<1x8xi1>, vector<1x8xf32>
    %9 = vector.extract_strided_slice %1 {offsets = [0, 0], sizes = [8, 16], strides = [1, 1]} : vector<8x96xf32> to vector<8x16xf32>
    %10 = arith.truncf %9 : vector<8x16xf32> to vector<8x16xbf16>
    %11 = vector.extract_strided_slice %1 {offsets = [0, 32], sizes = [8, 16], strides = [1, 1]} : vector<8x96xf32> to vector<8x16xf32>
    %12 = arith.truncf %11 : vector<8x16xf32> to vector<8x16xbf16>
    %13 = vector.extract_strided_slice %1 {offsets = [0, 64], sizes = [8, 16], strides = [1, 1]} : vector<8x96xf32> to vector<8x16xf32>
    %14 = arith.truncf %13 : vector<8x16xf32> to vector<8x16xbf16>
    %cst_7 = arith.constant dense<0.000000e+00> : vector<8x8xf32>
    %15 = tpu.matmul %10, %12, %cst_7 {dimension_numbers = #tpu.dot_dimension_numbers<[1], [1], [0], [0], [0, 0, 1, 0], [], []>} : vector<8x16xbf16>, vector<8x16xbf16>, vector<8x8xf32> -> vector<8x8xf32>
    %cst_8 = arith.constant 2.500000e-01 : f32
    %16 = vector.broadcast %cst_8 : f32 to vector<8x8xf32>
    %17 = arith.mulf %15, %16 : vector<8x8xf32>
    %18 = vector.broadcast %8 : vector<1x8xf32> to vector<8x8xf32>
    %19 = arith.addf %17, %18 : vector<8x8xf32>
    %cst_9 = arith.constant dense<0xFF800000> : vector<8xf32>
    %20 = vector.multi_reduction <maximumf>, %19, %cst_9 [1] : vector<8x8xf32> to vector<8xf32>
    %21 = vector.shape_cast %20 : vector<8xf32> to vector<8x1xf32>
    %22 = vector.broadcast %21 : vector<8x1xf32> to vector<8x8xf32>
    %23 = arith.subf %19, %22 : vector<8x8xf32>
    %24 = math.exp %23 : vector<8x8xf32>
    %cst_10 = arith.constant dense<0.000000e+00> : vector<8xf32>
    %25 = vector.multi_reduction <add>, %24, %cst_10 [1] : vector<8x8xf32> to vector<8xf32>
    %26 = vector.shape_cast %25 : vector<8xf32> to vector<8x1xf32>
    %27 = tpu.reciprocal %26 {approx = true} : vector<8x1xf32> -> vector<8x1xf32>
    %28 = vector.broadcast %27 : vector<8x1xf32> to vector<8x8xf32>
    %29 = arith.mulf %24, %28 : vector<8x8xf32>
    %30 = arith.truncf %29 : vector<8x8xf32> to vector<8x8xbf16>
    %cst_11 = arith.constant dense<0.000000e+00> : vector<8x16xf32>
    %31 = tpu.matmul %30, %14, %cst_11 {dimension_numbers = #tpu.dot_dimension_numbers<[1], [0], [0], [1], [0, 0, 1, 1], [], []>} : vector<8x8xbf16>, vector<8x16xbf16>, vector<8x16xf32> -> vector<8x16xf32>
    %32 = vector.extract_strided_slice %1 {offsets = [0, 16], sizes = [8, 16], strides = [1, 1]} : vector<8x96xf32> to vector<8x16xf32>
    %33 = arith.truncf %32 : vector<8x16xf32> to vector<8x16xbf16>
    %34 = vector.extract_strided_slice %1 {offsets = [0, 48], sizes = [8, 16], strides = [1, 1]} : vector<8x96xf32> to vector<8x16xf32>
    %35 = arith.truncf %34 : vector<8x16xf32> to vector<8x16xbf16>
    %36 = vector.extract_strided_slice %1 {offsets = [0, 80], sizes = [8, 16], strides = [1, 1]} : vector<8x96xf32> to vector<8x16xf32>
    %37 = arith.truncf %36 : vector<8x16xf32> to vector<8x16xbf16>
    %cst_12 = arith.constant dense<0.000000e+00> : vector<8x8xf32>
    %38 = tpu.matmul %33, %35, %cst_12 {dimension_numbers = #tpu.dot_dimension_numbers<[1], [1], [0], [0], [0, 0, 1, 0], [], []>} : vector<8x16xbf16>, vector<8x16xbf16>, vector<8x8xf32> -> vector<8x8xf32>
    %cst_13 = arith.constant 2.500000e-01 : f32
    %39 = vector.broadcast %cst_13 : f32 to vector<8x8xf32>
    %40 = arith.mulf %38, %39 : vector<8x8xf32>
    %41 = vector.broadcast %8 : vector<1x8xf32> to vector<8x8xf32>
    %42 = arith.addf %40, %41 : vector<8x8xf32>
    %cst_14 = arith.constant dense<0xFF800000> : vector<8xf32>
    %43 = vector.multi_reduction <maximumf>, %42, %cst_14 [1] : vector<8x8xf32> to vector<8xf32>
    %44 = vector.shape_cast %43 : vector<8xf32> to vector<8x1xf32>
    %45 = vector.broadcast %44 : vector<8x1xf32> to vector<8x8xf32>
    %46 = arith.subf %42, %45 : vector<8x8xf32>
    %47 = math.exp %46 : vector<8x8xf32>
    %cst_15 = arith.constant dense<0.000000e+00> : vector<8xf32>
    %48 = vector.multi_reduction <add>, %47, %cst_15 [1] : vector<8x8xf32> to vector<8xf32>
    %49 = vector.shape_cast %48 : vector<8xf32> to vector<8x1xf32>
    %50 = tpu.reciprocal %49 {approx = true} : vector<8x1xf32> -> vector<8x1xf32>
    %51 = vector.broadcast %50 : vector<8x1xf32> to vector<8x8xf32>
    %52 = arith.mulf %47, %51 : vector<8x8xf32>
    %53 = arith.truncf %52 : vector<8x8xf32> to vector<8x8xbf16>
    %cst_16 = arith.constant dense<0.000000e+00> : vector<8x16xf32>
    %54 = tpu.matmul %53, %37, %cst_16 {dimension_numbers = #tpu.dot_dimension_numbers<[1], [0], [0], [1], [0, 0, 1, 1], [], []>} : vector<8x8xbf16>, vector<8x16xbf16>, vector<8x16xf32> -> vector<8x16xf32>
    %55 = tpu.concatenate %31, %54 in 1 : vector<8x16xf32>, vector<8x16xf32> -> vector<8x32xf32>
    %c0_17 = arith.constant 0 : index
    %c0_18 = arith.constant 0 : index
    %c0_19 = arith.constant 0 : index
    %56 = vector.load %arg3[%c0_17, %c0_18, %c0_19] : memref<1x8x32xf32, #tpu.memory_space<vmem>>, vector<1x8x32xf32>
    %57 = vector.shape_cast %56 : vector<1x8x32xf32> to vector<8x32xf32>
    %58 = vector.shape_cast %55 : vector<8x32xf32> to vector<1x8x32xf32>
    tpu.vector_store %arg3[%c0_17, %c0_18, %c0_19], %58 {strides = array<i32>} : memref<1x8x32xf32, #tpu.memory_space<vmem>>, vector<1x8x32xf32>,
    return
  }
  func.func @transform_0(%arg0: i32) -> (i32, i32, i32) {
    %c0_i32 = arith.constant 0 : i32
    %c0_i32_0 = arith.constant 0 : i32
    %c0_i32_1 = arith.constant 0 : i32
    return %arg0, %c0_i32, %c0_i32_0 : i32, i32, i32
  }
  func.func @transform_1(%arg0: i32) -> (i32, i32, i32) {
    %c0_i32 = arith.constant 0 : i32
    %c0_i32_0 = arith.constant 0 : i32
    %c0_i32_1 = arith.constant 0 : i32
    return %arg0, %c0_i32, %c0_i32_0 : i32, i32, i32
  }
  func.func @transform_2(%arg0: i32) -> (i32, i32, i32) {
    %c0_i32 = arith.constant 0 : i32
    %c0_i32_0 = arith.constant 0 : i32
    %c0_i32_1 = arith.constant 0 : i32
    return %arg0, %c0_i32, %c0_i32_0 : i32, i32, i32
  }
}

module attributes {stable_mosaic.version = 11 : i64} {
  func.func @_linear_acc_kernel(%arg0: i32, %arg1: i32, %arg2: i32, %arg3: memref<16x32xf32, #tpu.memory_space<vmem>>, %arg4: memref<32x96xbf16, #tpu.memory_space<vmem>>, %arg5: memref<1x96xf32, #tpu.memory_space<vmem>>, %arg6: memref<16x96xf32, #tpu.memory_space<vmem>>, %arg7: memref<16x96xf32, #tpu.memory_space<vmem>>) attributes {dimension_semantics = [#tpu.dimension_semantics<parallel>, #tpu.dimension_semantics<parallel>, #tpu.dimension_semantics<arbitrary>], iteration_bounds = array<i64: 1, 1, 1>, scalar_prefetch = 0 : i64, scratch_operands = 1 : i64, tpu.core_type = #tpu.core_type<tc>, window_params = [{transform_indices = @transform_0, window_bounds = array<i64: 16, 32>}, {transform_indices = @transform_1, window_bounds = array<i64: 32, 96>}, {transform_indices = @transform_2, window_bounds = array<i64: 1, 96>}, {transform_indices = @transform_3, window_bounds = array<i64: 16, 96>}]} {
    %c0_i32 = arith.constant 0 : i32
    %0 = arith.cmpi eq, %arg2, %c0_i32 : i32
    %1 = arith.extui %0 : i1 to i32
    %c0_i32_0 = arith.constant 0 : i32
    %2 = arith.cmpi ne, %1, %c0_i32_0 : i32
    scf.if %2 {
      %cst_10 = arith.constant 0.000000e+00 : f32
      %13 = vector.broadcast %cst_10 : f32 to vector<16x96xf32>
      %c0_11 = arith.constant 0 : index
      %c0_12 = arith.constant 0 : index
      %14 = vector.load %arg7[%c0_11, %c0_12] : memref<16x96xf32, #tpu.memory_space<vmem>>, vector<16x96xf32>
      tpu.vector_store %arg7[%c0_11, %c0_12], %13 {strides = array<i32>} : memref<16x96xf32, #tpu.memory_space<vmem>>, vector<16x96xf32>,
    } else {
    }
    %c0 = arith.constant 0 : index
    %c0_1 = arith.constant 0 : index
    %3 = vector.load %arg7[%c0, %c0_1] : memref<16x96xf32, #tpu.memory_space<vmem>>, vector<16x96xf32>
    %c0_2 = arith.constant 0 : index
    %c0_3 = arith.constant 0 : index
    %4 = vector.load %arg3[%c0_2, %c0_3] : memref<16x32xf32, #tpu.memory_space<vmem>>, vector<16x32xf32>
    %5 = arith.truncf %4 : vector<16x32xf32> to vector<16x32xbf16>
    %c0_4 = arith.constant 0 : index
    %c0_5 = arith.constant 0 : index
    %6 = vector.load %arg4[%c0_4, %c0_5] : memref<32x96xbf16, #tpu.memory_space<vmem>>, vector<32x96xbf16>
    %cst = arith.constant dense<0.000000e+00> : vector<16x96xf32>
    %7 = tpu.matmul %5, %6, %cst {dimension_numbers = #tpu.dot_dimension_numbers<[1], [0], [0], [1], [0, 0, 1, 1], [], []>} : vector<16x32xbf16>, vector<32x96xbf16>, vector<16x96xf32> -> vector<16x96xf32>
    %8 = arith.addf %3, %7 : vector<16x96xf32>
    %c0_6 = arith.constant 0 : index
    %c0_7 = arith.constant 0 : index
    %9 = vector.load %arg7[%c0_6, %c0_7] : memref<16x96xf32, #tpu.memory_space<vmem>>, vector<16x96xf32>
    tpu.vector_store %arg7[%c0_6, %c0_7], %8 {strides = array<i32>} : memref<16x96xf32, #tpu.memory_space<vmem>>, vector<16x96xf32>,
    %c0_i32_8 = arith.constant 0 : i32
    %10 = arith.cmpi eq, %arg2, %c0_i32_8 : i32
    %11 = arith.extui %10 : i1 to i32
    %c0_i32_9 = arith.constant 0 : i32
    %12 = arith.cmpi ne, %11, %c0_i32_9 : i32
    scf.if %12 {
      %c0_10 = arith.constant 0 : index
      %c0_11 = arith.constant 0 : index
      %13 = vector.load %arg7[%c0_10, %c0_11] : memref<16x96xf32, #tpu.memory_space<vmem>>, vector<16x96xf32>
      %c0_12 = arith.constant 0 : index
      %c0_13 = arith.constant 0 : index
      %14 = vector.load %arg5[%c0_12, %c0_13] : memref<1x96xf32, #tpu.memory_space<vmem>>, vector<1x96xf32>
      %15 = vector.broadcast %14 : vector<1x96xf32> to vector<16x96xf32>
      %16 = arith.addf %13, %15 : vector<16x96xf32>
      %c0_14 = arith.constant 0 : index
      %c0_15 = arith.constant 0 : index
      %17 = vector.load %arg6[%c0_14, %c0_15] : memref<16x96xf32, #tpu.memory_space<vmem>>, vector<16x96xf32>
      tpu.vector_store %arg6[%c0_14, %c0_15], %16 {strides = array<i32>} : memref<16x96xf32, #tpu.memory_space<vmem>>, vector<16x96xf32>,
    } else {
    }
    return
  }
  func.func @transform_0(%arg0: i32, %arg1: i32, %arg2: i32) -> (i32, i32) {
    %c0_i32 = arith.constant 0 : i32
    return %arg0, %arg2 : i32, i32
  }
  func.func @transform_1(%arg0: i32, %arg1: i32, %arg2: i32) -> (i32, i32) {
    %c0_i32 = arith.constant 0 : i32
    return %arg2, %arg1 : i32, i32
  }
  func.func @transform_2(%arg0: i32, %arg1: i32, %arg2: i32) -> (i32, i32) {
    %c0_i32 = arith.constant 0 : i32
    %c0_i32_0 = arith.constant 0 : i32
    return %c0_i32, %arg1 : i32, i32
  }
  func.func @transform_3(%arg0: i32, %arg1: i32, %arg2: i32) -> (i32, i32) {
    %c0_i32 = arith.constant 0 : i32
    return %arg0, %arg1 : i32, i32
  }
}

module attributes {stable_mosaic.version = 11 : i64} {
  func.func @_proj_add_ln_kernel(%arg0: i32, %arg1: memref<16x32xf32, #tpu.memory_space<vmem>>, %arg2: memref<32x32xbf16, #tpu.memory_space<vmem>>, %arg3: memref<1x32xf32, #tpu.memory_space<vmem>>, %arg4: memref<16x32xf32, #tpu.memory_space<vmem>>, %arg5: memref<1x32xf32, #tpu.memory_space<vmem>>, %arg6: memref<1x32xf32, #tpu.memory_space<vmem>>, %arg7: memref<16x32xf32, #tpu.memory_space<vmem>>) attributes {dimension_semantics = [#tpu.dimension_semantics<parallel>], iteration_bounds = array<i64: 1>, scalar_prefetch = 0 : i64, scratch_operands = 0 : i64, tpu.core_type = #tpu.core_type<tc>, window_params = [{transform_indices = @transform_0, window_bounds = array<i64: 16, 32>}, {pipeline_mode = #tpu.pipeline_mode<synchronous>, transform_indices = @transform_1, window_bounds = array<i64: 32, 32>}, {pipeline_mode = #tpu.pipeline_mode<synchronous>, transform_indices = @transform_2, window_bounds = array<i64: 1, 32>}, {transform_indices = @transform_3, window_bounds = array<i64: 16, 32>}, {pipeline_mode = #tpu.pipeline_mode<synchronous>, transform_indices = @transform_4, window_bounds = array<i64: 1, 32>}, {pipeline_mode = #tpu.pipeline_mode<synchronous>, transform_indices = @transform_5, window_bounds = array<i64: 1, 32>}, {transform_indices = @transform_6, window_bounds = array<i64: 16, 32>}]} {
    %c0 = arith.constant 0 : index
    %c0_0 = arith.constant 0 : index
    %0 = vector.load %arg1[%c0, %c0_0] : memref<16x32xf32, #tpu.memory_space<vmem>>, vector<16x32xf32>
    %1 = arith.truncf %0 : vector<16x32xf32> to vector<16x32xbf16>
    %c0_1 = arith.constant 0 : index
    %c0_2 = arith.constant 0 : index
    %2 = vector.load %arg2[%c0_1, %c0_2] : memref<32x32xbf16, #tpu.memory_space<vmem>>, vector<32x32xbf16>
    %cst = arith.constant dense<0.000000e+00> : vector<16x32xf32>
    %3 = tpu.matmul %1, %2, %cst {dimension_numbers = #tpu.dot_dimension_numbers<[1], [0], [0], [1], [0, 0, 1, 1], [], []>} : vector<16x32xbf16>, vector<32x32xbf16>, vector<16x32xf32> -> vector<16x32xf32>
    %c0_3 = arith.constant 0 : index
    %c0_4 = arith.constant 0 : index
    %4 = vector.load %arg3[%c0_3, %c0_4] : memref<1x32xf32, #tpu.memory_space<vmem>>, vector<1x32xf32>
    %5 = vector.broadcast %4 : vector<1x32xf32> to vector<16x32xf32>
    %6 = arith.addf %3, %5 : vector<16x32xf32>
    %c0_5 = arith.constant 0 : index
    %c0_6 = arith.constant 0 : index
    %7 = vector.load %arg4[%c0_5, %c0_6] : memref<16x32xf32, #tpu.memory_space<vmem>>, vector<16x32xf32>
    %8 = arith.addf %6, %7 : vector<16x32xf32>
    %c0_7 = arith.constant 0 : index
    %c0_8 = arith.constant 0 : index
    %9 = vector.load %arg5[%c0_7, %c0_8] : memref<1x32xf32, #tpu.memory_space<vmem>>, vector<1x32xf32>
    %c0_9 = arith.constant 0 : index
    %c0_10 = arith.constant 0 : index
    %10 = vector.load %arg6[%c0_9, %c0_10] : memref<1x32xf32, #tpu.memory_space<vmem>>, vector<1x32xf32>
    %cst_11 = arith.constant dense<0.000000e+00> : vector<16xf32>
    %11 = vector.multi_reduction <add>, %8, %cst_11 [1] : vector<16x32xf32> to vector<16xf32>
    %12 = vector.shape_cast %11 : vector<16xf32> to vector<16x1xf32>
    %cst_12 = arith.constant 3.200000e+01 : f32
    %13 = vector.broadcast %cst_12 : f32 to vector<16x1xf32>
    %14 = arith.divf %12, %13 : vector<16x1xf32>
    %15 = vector.broadcast %14 : vector<16x1xf32> to vector<16x32xf32>
    %16 = arith.subf %8, %15 : vector<16x32xf32>
    %17 = arith.mulf %16, %16 : vector<16x32xf32>
    %cst_13 = arith.constant dense<0.000000e+00> : vector<16xf32>
    %18 = vector.multi_reduction <add>, %17, %cst_13 [1] : vector<16x32xf32> to vector<16xf32>
    %19 = vector.shape_cast %18 : vector<16xf32> to vector<16x1xf32>
    %cst_14 = arith.constant 3.200000e+01 : f32
    %20 = vector.broadcast %cst_14 : f32 to vector<16x1xf32>
    %21 = arith.divf %19, %20 : vector<16x1xf32>
    %22 = vector.broadcast %14 : vector<16x1xf32> to vector<16x32xf32>
    %23 = arith.subf %8, %22 : vector<16x32xf32>
    %cst_15 = arith.constant 9.99999996E-13 : f32
    %24 = vector.broadcast %cst_15 : f32 to vector<16x1xf32>
    %25 = arith.addf %21, %24 : vector<16x1xf32>
    %26 = math.rsqrt %25 : vector<16x1xf32>
    %27 = vector.broadcast %26 : vector<16x1xf32> to vector<16x32xf32>
    %28 = arith.mulf %23, %27 : vector<16x32xf32>
    %29 = vector.broadcast %9 : vector<1x32xf32> to vector<16x32xf32>
    %30 = arith.mulf %28, %29 : vector<16x32xf32>
    %31 = vector.broadcast %10 : vector<1x32xf32> to vector<16x32xf32>
    %32 = arith.addf %30, %31 : vector<16x32xf32>
    %c0_16 = arith.constant 0 : index
    %c0_17 = arith.constant 0 : index
    %33 = vector.load %arg7[%c0_16, %c0_17] : memref<16x32xf32, #tpu.memory_space<vmem>>, vector<16x32xf32>
    tpu.vector_store %arg7[%c0_16, %c0_17], %32 {strides = array<i32>} : memref<16x32xf32, #tpu.memory_space<vmem>>, vector<16x32xf32>,
    return
  }
  func.func @transform_0(%arg0: i32) -> (i32, i32) {
    %c0_i32 = arith.constant 0 : i32
    %c0_i32_0 = arith.constant 0 : i32
    return %arg0, %c0_i32 : i32, i32
  }
  func.func @transform_1(%arg0: i32) -> (i32, i32) {
    %c0_i32 = arith.constant 0 : i32
    %c0_i32_0 = arith.constant 0 : i32
    %c0_i32_1 = arith.constant 0 : i32
    return %c0_i32, %c0_i32_0 : i32, i32
  }
  func.func @transform_2(%arg0: i32) -> (i32, i32) {
    %c0_i32 = arith.constant 0 : i32
    %c0_i32_0 = arith.constant 0 : i32
    %c0_i32_1 = arith.constant 0 : i32
    return %c0_i32, %c0_i32_0 : i32, i32
  }
  func.func @transform_3(%arg0: i32) -> (i32, i32) {
    %c0_i32 = arith.constant 0 : i32
    %c0_i32_0 = arith.constant 0 : i32
    return %arg0, %c0_i32 : i32, i32
  }
  func.func @transform_4(%arg0: i32) -> (i32, i32) {
    %c0_i32 = arith.constant 0 : i32
    %c0_i32_0 = arith.constant 0 : i32
    %c0_i32_1 = arith.constant 0 : i32
    return %c0_i32, %c0_i32_0 : i32, i32
  }
  func.func @transform_5(%arg0: i32) -> (i32, i32) {
    %c0_i32 = arith.constant 0 : i32
    %c0_i32_0 = arith.constant 0 : i32
    %c0_i32_1 = arith.constant 0 : i32
    return %c0_i32, %c0_i32_0 : i32, i32
  }
  func.func @transform_6(%arg0: i32) -> (i32, i32) {
    %c0_i32 = arith.constant 0 : i32
    %c0_i32_0 = arith.constant 0 : i32
    return %arg0, %c0_i32 : i32, i32
  }
}

module attributes {stable_mosaic.version = 11 : i64} {
  func.func @_ffn_add_ln_kernel(%arg0: i32, %arg1: i32, %arg2: memref<16x32xf32, #tpu.memory_space<vmem>>, %arg3: memref<32x64xbf16, #tpu.memory_space<vmem>>, %arg4: memref<1x64xf32, #tpu.memory_space<vmem>>, %arg5: memref<64x32xbf16, #tpu.memory_space<vmem>>, %arg6: memref<1x32xf32, #tpu.memory_space<vmem>>, %arg7: memref<1x32xf32, #tpu.memory_space<vmem>>, %arg8: memref<1x32xf32, #tpu.memory_space<vmem>>, %arg9: memref<16x32xf32, #tpu.memory_space<vmem>>, %arg10: memref<16x32xf32, #tpu.memory_space<vmem>>) attributes {dimension_semantics = [#tpu.dimension_semantics<parallel>, #tpu.dimension_semantics<arbitrary>], iteration_bounds = array<i64: 1, 1>, scalar_prefetch = 0 : i64, scratch_operands = 1 : i64, tpu.core_type = #tpu.core_type<tc>, window_params = [{transform_indices = @transform_0, window_bounds = array<i64: 16, 32>}, {transform_indices = @transform_1, window_bounds = array<i64: 32, 64>}, {transform_indices = @transform_2, window_bounds = array<i64: 1, 64>}, {transform_indices = @transform_3, window_bounds = array<i64: 64, 32>}, {pipeline_mode = #tpu.pipeline_mode<synchronous>, transform_indices = @transform_4, window_bounds = array<i64: 1, 32>}, {pipeline_mode = #tpu.pipeline_mode<synchronous>, transform_indices = @transform_5, window_bounds = array<i64: 1, 32>}, {pipeline_mode = #tpu.pipeline_mode<synchronous>, transform_indices = @transform_6, window_bounds = array<i64: 1, 32>}, {transform_indices = @transform_7, window_bounds = array<i64: 16, 32>}]} {
    %c0_i32 = arith.constant 0 : i32
    %0 = arith.cmpi eq, %arg1, %c0_i32 : i32
    %1 = arith.extui %0 : i1 to i32
    %c0_i32_0 = arith.constant 0 : i32
    %2 = arith.cmpi ne, %1, %c0_i32_0 : i32
    scf.if %2 {
      %cst_19 = arith.constant 0.000000e+00 : f32
      %32 = vector.broadcast %cst_19 : f32 to vector<16x32xf32>
      %c0_20 = arith.constant 0 : index
      %c0_21 = arith.constant 0 : index
      %33 = vector.load %arg10[%c0_20, %c0_21] : memref<16x32xf32, #tpu.memory_space<vmem>>, vector<16x32xf32>
      tpu.vector_store %arg10[%c0_20, %c0_21], %32 {strides = array<i32>} : memref<16x32xf32, #tpu.memory_space<vmem>>, vector<16x32xf32>,
    } else {
    }
    %c0 = arith.constant 0 : index
    %c0_1 = arith.constant 0 : index
    %3 = vector.load %arg2[%c0, %c0_1] : memref<16x32xf32, #tpu.memory_space<vmem>>, vector<16x32xf32>
    %4 = arith.truncf %3 : vector<16x32xf32> to vector<16x32xbf16>
    %c0_2 = arith.constant 0 : index
    %c0_3 = arith.constant 0 : index
    %5 = vector.load %arg3[%c0_2, %c0_3] : memref<32x64xbf16, #tpu.memory_space<vmem>>, vector<32x64xbf16>
    %cst = arith.constant dense<0.000000e+00> : vector<16x64xf32>
    %6 = tpu.matmul %4, %5, %cst {dimension_numbers = #tpu.dot_dimension_numbers<[1], [0], [0], [1], [0, 0, 1, 1], [], []>} : vector<16x32xbf16>, vector<32x64xbf16>, vector<16x64xf32> -> vector<16x64xf32>
    %c0_4 = arith.constant 0 : index
    %c0_5 = arith.constant 0 : index
    %7 = vector.load %arg4[%c0_4, %c0_5] : memref<1x64xf32, #tpu.memory_space<vmem>>, vector<1x64xf32>
    %8 = vector.broadcast %7 : vector<1x64xf32> to vector<16x64xf32>
    %9 = arith.addf %6, %8 : vector<16x64xf32>
    %cst_6 = arith.constant 5.000000e-01 : f32
    %10 = vector.broadcast %cst_6 : f32 to vector<16x64xf32>
    %11 = arith.mulf %10, %9 : vector<16x64xf32>
    %cst_7 = arith.constant 4.471500e-02 : f32
    %12 = vector.broadcast %cst_7 : f32 to vector<16x64xf32>
    %13 = arith.mulf %12, %9 : vector<16x64xf32>
    %14 = arith.mulf %13, %9 : vector<16x64xf32>
    %15 = arith.mulf %14, %9 : vector<16x64xf32>
    %16 = arith.addf %9, %15 : vector<16x64xf32>
    %cst_8 = arith.constant 0.797884583 : f32
    %17 = vector.broadcast %cst_8 : f32 to vector<16x64xf32>
    %18 = arith.mulf %17, %16 : vector<16x64xf32>
    %19 = math.tanh %18 : vector<16x64xf32>
    %cst_9 = arith.constant 1.000000e+00 : f32
    %20 = vector.broadcast %cst_9 : f32 to vector<16x64xf32>
    %21 = arith.addf %20, %19 : vector<16x64xf32>
    %22 = arith.mulf %11, %21 : vector<16x64xf32>
    %c0_10 = arith.constant 0 : index
    %c0_11 = arith.constant 0 : index
    %23 = vector.load %arg10[%c0_10, %c0_11] : memref<16x32xf32, #tpu.memory_space<vmem>>, vector<16x32xf32>
    %24 = arith.truncf %22 : vector<16x64xf32> to vector<16x64xbf16>
    %c0_12 = arith.constant 0 : index
    %c0_13 = arith.constant 0 : index
    %25 = vector.load %arg5[%c0_12, %c0_13] : memref<64x32xbf16, #tpu.memory_space<vmem>>, vector<64x32xbf16>
    %cst_14 = arith.constant dense<0.000000e+00> : vector<16x32xf32>
    %26 = tpu.matmul %24, %25, %cst_14 {dimension_numbers = #tpu.dot_dimension_numbers<[1], [0], [0], [1], [0, 0, 1, 1], [], []>} : vector<16x64xbf16>, vector<64x32xbf16>, vector<16x32xf32> -> vector<16x32xf32>
    %27 = arith.addf %23, %26 : vector<16x32xf32>
    %c0_15 = arith.constant 0 : index
    %c0_16 = arith.constant 0 : index
    %28 = vector.load %arg10[%c0_15, %c0_16] : memref<16x32xf32, #tpu.memory_space<vmem>>, vector<16x32xf32>
    tpu.vector_store %arg10[%c0_15, %c0_16], %27 {strides = array<i32>} : memref<16x32xf32, #tpu.memory_space<vmem>>, vector<16x32xf32>,
    %c0_i32_17 = arith.constant 0 : i32
    %29 = arith.cmpi eq, %arg1, %c0_i32_17 : i32
    %30 = arith.extui %29 : i1 to i32
    %c0_i32_18 = arith.constant 0 : i32
    %31 = arith.cmpi ne, %30, %c0_i32_18 : i32
    scf.if %31 {
      %c0_19 = arith.constant 0 : index
      %c0_20 = arith.constant 0 : index
      %32 = vector.load %arg10[%c0_19, %c0_20] : memref<16x32xf32, #tpu.memory_space<vmem>>, vector<16x32xf32>
      %c0_21 = arith.constant 0 : index
      %c0_22 = arith.constant 0 : index
      %33 = vector.load %arg6[%c0_21, %c0_22] : memref<1x32xf32, #tpu.memory_space<vmem>>, vector<1x32xf32>
      %34 = vector.broadcast %33 : vector<1x32xf32> to vector<16x32xf32>
      %35 = arith.addf %32, %34 : vector<16x32xf32>
      %c0_23 = arith.constant 0 : index
      %c0_24 = arith.constant 0 : index
      %36 = vector.load %arg2[%c0_23, %c0_24] : memref<16x32xf32, #tpu.memory_space<vmem>>, vector<16x32xf32>
      %37 = arith.addf %35, %36 : vector<16x32xf32>
      %c0_25 = arith.constant 0 : index
      %c0_26 = arith.constant 0 : index
      %38 = vector.load %arg7[%c0_25, %c0_26] : memref<1x32xf32, #tpu.memory_space<vmem>>, vector<1x32xf32>
      %c0_27 = arith.constant 0 : index
      %c0_28 = arith.constant 0 : index
      %39 = vector.load %arg8[%c0_27, %c0_28] : memref<1x32xf32, #tpu.memory_space<vmem>>, vector<1x32xf32>
      %cst_29 = arith.constant dense<0.000000e+00> : vector<16xf32>
      %40 = vector.multi_reduction <add>, %37, %cst_29 [1] : vector<16x32xf32> to vector<16xf32>
      %41 = vector.shape_cast %40 : vector<16xf32> to vector<16x1xf32>
      %cst_30 = arith.constant 3.200000e+01 : f32
      %42 = vector.broadcast %cst_30 : f32 to vector<16x1xf32>
      %43 = arith.divf %41, %42 : vector<16x1xf32>
      %44 = vector.broadcast %43 : vector<16x1xf32> to vector<16x32xf32>
      %45 = arith.subf %37, %44 : vector<16x32xf32>
      %46 = arith.mulf %45, %45 : vector<16x32xf32>
      %cst_31 = arith.constant dense<0.000000e+00> : vector<16xf32>
      %47 = vector.multi_reduction <add>, %46, %cst_31 [1] : vector<16x32xf32> to vector<16xf32>
      %48 = vector.shape_cast %47 : vector<16xf32> to vector<16x1xf32>
      %cst_32 = arith.constant 3.200000e+01 : f32
      %49 = vector.broadcast %cst_32 : f32 to vector<16x1xf32>
      %50 = arith.divf %48, %49 : vector<16x1xf32>
      %51 = vector.broadcast %43 : vector<16x1xf32> to vector<16x32xf32>
      %52 = arith.subf %37, %51 : vector<16x32xf32>
      %cst_33 = arith.constant 9.99999996E-13 : f32
      %53 = vector.broadcast %cst_33 : f32 to vector<16x1xf32>
      %54 = arith.addf %50, %53 : vector<16x1xf32>
      %55 = math.rsqrt %54 : vector<16x1xf32>
      %56 = vector.broadcast %55 : vector<16x1xf32> to vector<16x32xf32>
      %57 = arith.mulf %52, %56 : vector<16x32xf32>
      %58 = vector.broadcast %38 : vector<1x32xf32> to vector<16x32xf32>
      %59 = arith.mulf %57, %58 : vector<16x32xf32>
      %60 = vector.broadcast %39 : vector<1x32xf32> to vector<16x32xf32>
      %61 = arith.addf %59, %60 : vector<16x32xf32>
      %c0_34 = arith.constant 0 : index
      %c0_35 = arith.constant 0 : index
      %62 = vector.load %arg9[%c0_34, %c0_35] : memref<16x32xf32, #tpu.memory_space<vmem>>, vector<16x32xf32>
      tpu.vector_store %arg9[%c0_34, %c0_35], %61 {strides = array<i32>} : memref<16x32xf32, #tpu.memory_space<vmem>>, vector<16x32xf32>,
    } else {
    }
    return
  }
  func.func @transform_0(%arg0: i32, %arg1: i32) -> (i32, i32) {
    %c0_i32 = arith.constant 0 : i32
    %c0_i32_0 = arith.constant 0 : i32
    return %arg0, %c0_i32 : i32, i32
  }
  func.func @transform_1(%arg0: i32, %arg1: i32) -> (i32, i32) {
    %c0_i32 = arith.constant 0 : i32
    %c0_i32_0 = arith.constant 0 : i32
    return %c0_i32, %arg1 : i32, i32
  }
  func.func @transform_2(%arg0: i32, %arg1: i32) -> (i32, i32) {
    %c0_i32 = arith.constant 0 : i32
    %c0_i32_0 = arith.constant 0 : i32
    return %c0_i32, %arg1 : i32, i32
  }
  func.func @transform_3(%arg0: i32, %arg1: i32) -> (i32, i32) {
    %c0_i32 = arith.constant 0 : i32
    %c0_i32_0 = arith.constant 0 : i32
    return %arg1, %c0_i32 : i32, i32
  }
  func.func @transform_4(%arg0: i32, %arg1: i32) -> (i32, i32) {
    %c0_i32 = arith.constant 0 : i32
    %c0_i32_0 = arith.constant 0 : i32
    %c0_i32_1 = arith.constant 0 : i32
    return %c0_i32, %c0_i32_0 : i32, i32
  }
  func.func @transform_5(%arg0: i32, %arg1: i32) -> (i32, i32) {
    %c0_i32 = arith.constant 0 : i32
    %c0_i32_0 = arith.constant 0 : i32
    %c0_i32_1 = arith.constant 0 : i32
    return %c0_i32, %c0_i32_0 : i32, i32
  }
  func.func @transform_6(%arg0: i32, %arg1: i32) -> (i32, i32) {
    %c0_i32 = arith.constant 0 : i32
    %c0_i32_0 = arith.constant 0 : i32
    %c0_i32_1 = arith.constant 0 : i32
    return %c0_i32, %c0_i32_0 : i32, i32
  }
  func.func @transform_7(%arg0: i32, %arg1: i32) -> (i32, i32) {
    %c0_i32 = arith.constant 0 : i32
    %c0_i32_0 = arith.constant 0 : i32
    return %arg0, %c0_i32 : i32, i32
  }
}

module attributes {stable_mosaic.version = 11 : i64} {
  func.func @_linear_lse_kernel(%arg0: i32, %arg1: i32, %arg2: i32, %arg3: memref<16x32xf32, #tpu.memory_space<vmem>>, %arg4: memref<32x100xbf16, #tpu.memory_space<vmem>>, %arg5: memref<1x100xf32, #tpu.memory_space<vmem>>, %arg6: memref<16x100xf32, #tpu.memory_space<vmem>>, %arg7: memref<16x1xf32, #tpu.memory_space<vmem>>, %arg8: memref<16x100xf32, #tpu.memory_space<vmem>>, %arg9: memref<16x1xf32, #tpu.memory_space<vmem>>, %arg10: memref<16x1xf32, #tpu.memory_space<vmem>>) attributes {dimension_semantics = [#tpu.dimension_semantics<parallel>, #tpu.dimension_semantics<arbitrary>, #tpu.dimension_semantics<arbitrary>], iteration_bounds = array<i64: 1, 1, 1>, scalar_prefetch = 0 : i64, scratch_operands = 3 : i64, tpu.core_type = #tpu.core_type<tc>, window_params = [{transform_indices = @transform_0, window_bounds = array<i64: 16, 32>}, {transform_indices = @transform_1, window_bounds = array<i64: 32, 100>}, {transform_indices = @transform_2, window_bounds = array<i64: 1, 100>}, {transform_indices = @transform_3, window_bounds = array<i64: 16, 100>}, {transform_indices = @transform_4, window_bounds = array<i64: 16, 1>}]} {
    %c0_i32 = arith.constant 0 : i32
    %0 = arith.cmpi eq, %arg1, %c0_i32 : i32
    %c0_i32_0 = arith.constant 0 : i32
    %1 = arith.cmpi eq, %arg2, %c0_i32_0 : i32
    %2 = arith.andi %0, %1 : i1
    %3 = arith.extui %2 : i1 to i32
    %c0_i32_1 = arith.constant 0 : i32
    %4 = arith.cmpi ne, %3, %c0_i32_1 : i32
    scf.if %4 {
      %cst_16 = arith.constant 0xFF800000 : f32
      %23 = vector.broadcast %cst_16 : f32 to vector<16x1xf32>
      %c0_17 = arith.constant 0 : index
      %c0_18 = arith.constant 0 : index
      %24 = vector.load %arg9[%c0_17, %c0_18] : memref<16x1xf32, #tpu.memory_space<vmem>>, vector<16x1xf32>
      tpu.vector_store %arg9[%c0_17, %c0_18], %23 {strides = array<i32>} : memref<16x1xf32, #tpu.memory_space<vmem>>, vector<16x1xf32>,
      %cst_19 = arith.constant 0.000000e+00 : f32
      %25 = vector.broadcast %cst_19 : f32 to vector<16x1xf32>
      %c0_20 = arith.constant 0 : index
      %c0_21 = arith.constant 0 : index
      %26 = vector.load %arg10[%c0_20, %c0_21] : memref<16x1xf32, #tpu.memory_space<vmem>>, vector<16x1xf32>
      tpu.vector_store %arg10[%c0_20, %c0_21], %25 {strides = array<i32>} : memref<16x1xf32, #tpu.memory_space<vmem>>, vector<16x1xf32>,
    } else {
    }
    %c0_i32_2 = arith.constant 0 : i32
    %5 = arith.cmpi eq, %arg2, %c0_i32_2 : i32
    %6 = arith.extui %5 : i1 to i32
    %c0_i32_3 = arith.constant 0 : i32
    %7 = arith.cmpi ne, %6, %c0_i32_3 : i32
    scf.if %7 {
      %cst_16 = arith.constant 0.000000e+00 : f32
      %23 = vector.broadcast %cst_16 : f32 to vector<16x100xf32>
      %c0_17 = arith.constant 0 : index
      %c0_18 = arith.constant 0 : index
      %24 = vector.load %arg8[%c0_17, %c0_18] : memref<16x100xf32, #tpu.memory_space<vmem>>, vector<16x100xf32>
      tpu.vector_store %arg8[%c0_17, %c0_18], %23 {strides = array<i32>} : memref<16x100xf32, #tpu.memory_space<vmem>>, vector<16x100xf32>,
    } else {
    }
    %c0 = arith.constant 0 : index
    %c0_4 = arith.constant 0 : index
    %8 = vector.load %arg8[%c0, %c0_4] : memref<16x100xf32, #tpu.memory_space<vmem>>, vector<16x100xf32>
    %c0_5 = arith.constant 0 : index
    %c0_6 = arith.constant 0 : index
    %9 = vector.load %arg3[%c0_5, %c0_6] : memref<16x32xf32, #tpu.memory_space<vmem>>, vector<16x32xf32>
    %10 = arith.truncf %9 : vector<16x32xf32> to vector<16x32xbf16>
    %c0_7 = arith.constant 0 : index
    %c0_8 = arith.constant 0 : index
    %11 = vector.load %arg4[%c0_7, %c0_8] : memref<32x100xbf16, #tpu.memory_space<vmem>>, vector<32x100xbf16>
    %cst = arith.constant dense<0.000000e+00> : vector<16x100xf32>
    %12 = tpu.matmul %10, %11, %cst {dimension_numbers = #tpu.dot_dimension_numbers<[1], [0], [0], [1], [0, 0, 1, 1], [], []>} : vector<16x32xbf16>, vector<32x100xbf16>, vector<16x100xf32> -> vector<16x100xf32>
    %13 = arith.addf %8, %12 : vector<16x100xf32>
    %c0_9 = arith.constant 0 : index
    %c0_10 = arith.constant 0 : index
    %14 = vector.load %arg8[%c0_9, %c0_10] : memref<16x100xf32, #tpu.memory_space<vmem>>, vector<16x100xf32>
    tpu.vector_store %arg8[%c0_9, %c0_10], %13 {strides = array<i32>} : memref<16x100xf32, #tpu.memory_space<vmem>>, vector<16x100xf32>,
    %c0_i32_11 = arith.constant 0 : i32
    %15 = arith.cmpi eq, %arg2, %c0_i32_11 : i32
    %16 = arith.extui %15 : i1 to i32
    %c0_i32_12 = arith.constant 0 : i32
    %17 = arith.cmpi ne, %16, %c0_i32_12 : i32
    scf.if %17 {
      %c0_16 = arith.constant 0 : index
      %c0_17 = arith.constant 0 : index
      %23 = vector.load %arg8[%c0_16, %c0_17] : memref<16x100xf32, #tpu.memory_space<vmem>>, vector<16x100xf32>
      %c0_18 = arith.constant 0 : index
      %c0_19 = arith.constant 0 : index
      %24 = vector.load %arg5[%c0_18, %c0_19] : memref<1x100xf32, #tpu.memory_space<vmem>>, vector<1x100xf32>
      %25 = vector.broadcast %24 : vector<1x100xf32> to vector<16x100xf32>
      %26 = arith.addf %23, %25 : vector<16x100xf32>
      %c0_20 = arith.constant 0 : index
      %c0_21 = arith.constant 0 : index
      %27 = vector.load %arg6[%c0_20, %c0_21] : memref<16x100xf32, #tpu.memory_space<vmem>>, vector<16x100xf32>
      tpu.vector_store %arg6[%c0_20, %c0_21], %26 {strides = array<i32>} : memref<16x100xf32, #tpu.memory_space<vmem>>, vector<16x100xf32>,
      %c0_22 = arith.constant 0 : index
      %c0_23 = arith.constant 0 : index
      %28 = vector.load %arg9[%c0_22, %c0_23] : memref<16x1xf32, #tpu.memory_space<vmem>>, vector<16x1xf32>
      %cst_24 = arith.constant dense<0xFF800000> : vector<16xf32>
      %29 = vector.multi_reduction <maximumf>, %26, %cst_24 [1] : vector<16x100xf32> to vector<16xf32>
      %30 = vector.shape_cast %29 : vector<16xf32> to vector<16x1xf32>
      %31 = arith.maximumf %28, %30 : vector<16x1xf32>
      %c0_25 = arith.constant 0 : index
      %c0_26 = arith.constant 0 : index
      %32 = vector.load %arg10[%c0_25, %c0_26] : memref<16x1xf32, #tpu.memory_space<vmem>>, vector<16x1xf32>
      %33 = arith.subf %28, %31 : vector<16x1xf32>
      %34 = math.exp %33 : vector<16x1xf32>
      %35 = arith.mulf %32, %34 : vector<16x1xf32>
      %36 = vector.broadcast %31 : vector<16x1xf32> to vector<16x100xf32>
      %37 = arith.subf %26, %36 : vector<16x100xf32>
      %38 = math.exp %37 : vector<16x100xf32>
      %cst_27 = arith.constant dense<0.000000e+00> : vector<16xf32>
      %39 = vector.multi_reduction <add>, %38, %cst_27 [1] : vector<16x100xf32> to vector<16xf32>
      %40 = vector.shape_cast %39 : vector<16xf32> to vector<16x1xf32>
      %41 = arith.addf %35, %40 : vector<16x1xf32>
      %c0_28 = arith.constant 0 : index
      %c0_29 = arith.constant 0 : index
      %42 = vector.load %arg10[%c0_28, %c0_29] : memref<16x1xf32, #tpu.memory_space<vmem>>, vector<16x1xf32>
      tpu.vector_store %arg10[%c0_28, %c0_29], %41 {strides = array<i32>} : memref<16x1xf32, #tpu.memory_space<vmem>>, vector<16x1xf32>,
      %c0_30 = arith.constant 0 : index
      %c0_31 = arith.constant 0 : index
      %43 = vector.load %arg9[%c0_30, %c0_31] : memref<16x1xf32, #tpu.memory_space<vmem>>, vector<16x1xf32>
      tpu.vector_store %arg9[%c0_30, %c0_31], %31 {strides = array<i32>} : memref<16x1xf32, #tpu.memory_space<vmem>>, vector<16x1xf32>,
    } else {
    }
    %c0_i32_13 = arith.constant 0 : i32
    %18 = arith.cmpi eq, %arg1, %c0_i32_13 : i32
    %c0_i32_14 = arith.constant 0 : i32
    %19 = arith.cmpi eq, %arg2, %c0_i32_14 : i32
    %20 = arith.andi %18, %19 : i1
    %21 = arith.extui %20 : i1 to i32
    %c0_i32_15 = arith.constant 0 : i32
    %22 = arith.cmpi ne, %21, %c0_i32_15 : i32
    scf.if %22 {
      %c0_16 = arith.constant 0 : index
      %c0_17 = arith.constant 0 : index
      %23 = vector.load %arg9[%c0_16, %c0_17] : memref<16x1xf32, #tpu.memory_space<vmem>>, vector<16x1xf32>
      %c0_18 = arith.constant 0 : index
      %c0_19 = arith.constant 0 : index
      %24 = vector.load %arg10[%c0_18, %c0_19] : memref<16x1xf32, #tpu.memory_space<vmem>>, vector<16x1xf32>
      %25 = math.log %24 : vector<16x1xf32>
      %26 = arith.addf %23, %25 : vector<16x1xf32>
      %c0_20 = arith.constant 0 : index
      %c0_21 = arith.constant 0 : index
      %27 = vector.load %arg7[%c0_20, %c0_21] : memref<16x1xf32, #tpu.memory_space<vmem>>, vector<16x1xf32>
      tpu.vector_store %arg7[%c0_20, %c0_21], %26 {strides = array<i32>} : memref<16x1xf32, #tpu.memory_space<vmem>>, vector<16x1xf32>,
    } else {
    }
    return
  }
  func.func @transform_0(%arg0: i32, %arg1: i32, %arg2: i32) -> (i32, i32) {
    %c0_i32 = arith.constant 0 : i32
    return %arg0, %arg2 : i32, i32
  }
  func.func @transform_1(%arg0: i32, %arg1: i32, %arg2: i32) -> (i32, i32) {
    %c0_i32 = arith.constant 0 : i32
    return %arg2, %arg1 : i32, i32
  }
  func.func @transform_2(%arg0: i32, %arg1: i32, %arg2: i32) -> (i32, i32) {
    %c0_i32 = arith.constant 0 : i32
    %c0_i32_0 = arith.constant 0 : i32
    return %c0_i32, %arg1 : i32, i32
  }
  func.func @transform_3(%arg0: i32, %arg1: i32, %arg2: i32) -> (i32, i32) {
    %c0_i32 = arith.constant 0 : i32
    return %arg0, %arg1 : i32, i32
  }
  func.func @transform_4(%arg0: i32, %arg1: i32, %arg2: i32) -> (i32, i32) {
    %c0_i32 = arith.constant 0 : i32
    %c0_i32_0 = arith.constant 0 : i32
    return %arg0, %c0_i32 : i32, i32
  }
}

module attributes {stable_mosaic.version = 11 : i64} {
  func.func @_sub_lse_kernel(%arg0: i32, %arg1: i32, %arg2: memref<16x100xf32, #tpu.memory_space<vmem>>, %arg3: memref<16x1xf32, #tpu.memory_space<vmem>>, %arg4: memref<16x100xf32, #tpu.memory_space<vmem>>) attributes {dimension_semantics = [#tpu.dimension_semantics<parallel>, #tpu.dimension_semantics<parallel>], iteration_bounds = array<i64: 1, 1>, scalar_prefetch = 0 : i64, scratch_operands = 0 : i64, tpu.core_type = #tpu.core_type<tc>, window_params = [{transform_indices = @transform_0, window_bounds = array<i64: 16, 100>}, {transform_indices = @transform_1, window_bounds = array<i64: 16, 1>}, {transform_indices = @transform_2, window_bounds = array<i64: 16, 100>}]} {
    %c0 = arith.constant 0 : index
    %c0_0 = arith.constant 0 : index
    %0 = vector.load %arg2[%c0, %c0_0] : memref<16x100xf32, #tpu.memory_space<vmem>>, vector<16x100xf32>
    %c0_1 = arith.constant 0 : index
    %c0_2 = arith.constant 0 : index
    %1 = vector.load %arg3[%c0_1, %c0_2] : memref<16x1xf32, #tpu.memory_space<vmem>>, vector<16x1xf32>
    %2 = vector.broadcast %1 : vector<16x1xf32> to vector<16x100xf32>
    %3 = arith.subf %0, %2 : vector<16x100xf32>
    %c0_3 = arith.constant 0 : index
    %c0_4 = arith.constant 0 : index
    %4 = vector.load %arg4[%c0_3, %c0_4] : memref<16x100xf32, #tpu.memory_space<vmem>>, vector<16x100xf32>
    tpu.vector_store %arg4[%c0_3, %c0_4], %3 {strides = array<i32>} : memref<16x100xf32, #tpu.memory_space<vmem>>, vector<16x100xf32>,
    return
  }
  func.func @transform_0(%arg0: i32, %arg1: i32) -> (i32, i32) {
    %c0_i32 = arith.constant 0 : i32
    return %arg0, %arg1 : i32, i32
  }
  func.func @transform_1(%arg0: i32, %arg1: i32) -> (i32, i32) {
    %c0_i32 = arith.constant 0 : i32
    %c0_i32_0 = arith.constant 0 : i32
    return %arg0, %c0_i32 : i32, i32
  }
  func.func @transform_2(%arg0: i32, %arg1: i32) -> (i32, i32) {
    %c0_i32 = arith.constant 0 : i32
    return %arg0, %arg1 : i32, i32
  }
}

</mosaic_0001>

<bundles_post_ra>
// kernel: bert_lm_forward.10
= control target key start
LH: loop header
LB: loop body
LE: loop exit
PB: predicated region body
PF: predicated region fallthrough
CT: control target
= control target key end

     0   :  { %vm19_vm0 = vcmask 785408   ;;  %v132_v0 = vmov 0.0   ;;  %vm133_vm1 = vmmov 0   ;;  %vm43_vm2 = vcmask 261120   ;;  %s181_s1 = inlined_call_operand.vmem [shape: bf16[32,96], index: 1, kind: input, shape index: {}]   ;;  %s182_s0 = inlined_call_operand.vmem [shape: f32[16,32], index: 0, kind: input, shape index: {}]   ;;  %s183_s2 = inlined_call_operand.vmem [shape: f32[1,96], index: 2, kind: input, shape index: {}]   ;;  %s184_s3 = inlined_call_operand.vmem [shape: f32[16,96], index: 3, kind: output, shape index: {}]  }
   0x1   :  { %120 = vmatprep.subr.bf16.mxu0 %v132_v0  ;;  %v130_v1 = vld [vmem:[%s181_s1] sm:$0xff]   ;;  %124 = vmatprep.mubr.msk.bf16.mxu0 %vm133_vm1, %v132_v0  ;;  %20 = vst.msk [vmem:[#allocation2] sm:$0xff] %vm19_vm0, %v132_v0  ;;  %21 = vst.msk [vmem:[#allocation2 + $0x8] sm:$0xff] %vm19_vm0, %v132_v0  ;;  %v131_v2 = vld [vmem:[%s181_s1 + $0x8] sm:$0xff]  }
   0x2   :  { %121 = vmatpush3.bf16.msra.mxu0 %v130_v1  ;;  %v24_v3 = vld [vmem:[%s182_s0] sm:$0xff]  ;;  %v25_v4 = vld [vmem:[%s182_s0 + $0x8] sm:$0xff] }
   0x3   :  { %122 = vmatprep.subr.bf16.mxu0 %v132_v0  ;;  %v26_v5 = vpack.c.bf16 %v25_v4, %v24_v3  ;;  %v116_v14 = vld [vmem:[%s183_s2] ss:$0 sm:$0xff] }
   0x6   :  { %123 = vmatpush3.bf16.msra.mxu0 %v131_v2 }
   0x8   :  { %v22_v6 = vld [vmem:[#allocation2] sm:$0xff]  ;;  %v23_v8 = vld [vmem:[#allocation2 + $0x8] sm:$0xff] }
   0x9   :  { %125 = vmatmul.mubr.msk.bf16.vlgmr.msra.gmra.mrb[0].mxu0 %vm43_vm2, %v26_v5 }
  0xdc   :  { %v81_v7 = vpop.f32.mrb[0].mxu0 }
  0xdd   :  { %v88_v9 = vadd.f32 %v81_v7, %v22_v6  ;;  %v126_v10 = vpop.f32.mrb[1].mxu0 }
  0xde   :  { %v84_v11 = vpop.f32.mrb[2].mxu0 }
  0xdf   :  { %91 = vst.msk [vmem:[#allocation2] sm:$0xff] %vm19_vm0, %v88_v9  ;;  %v89_v12 = vadd.f32 %v84_v11, %v23_v8  ;;  %v127_v13 = vpop.f32.mrb[3].mxu0 }
  0xe1   :  { %92 = vst.msk [vmem:[#allocation2 + $0x8] sm:$0xff] %vm19_vm0, %v89_v12 }
  0xe6   :  { %v96_v15 = vld [vmem:[#allocation2] sm:$0xff] }
  0xe7   :  { %v105_v16 = vadd.f32 %v116_v14, %v96_v15 }
  0xe8   :  { %v97_v17 = vld [vmem:[#allocation2 + $0x8] sm:$0xff] }
  0xe9   :  { %107 = vst.msk [vmem:[%s184_s3] sm:$0xff] %vm19_vm0, %v105_v16  ;;  %v106_v18 = vadd.f32 %v116_v14, %v97_v17 }
  0xeb   :  { %108 = vst.msk [vmem:[%s184_s3 + $0x8] sm:$0xff] %vm19_vm0, %v106_v18 }

// kernel: bert_lm_forward.12
= control target key start
LH: loop header
LB: loop body
LE: loop exit
PB: predicated region body
PF: predicated region fallthrough
CT: control target
= control target key end

     0   :  { %v175_v0 = vmov 0.0   ;;  %vm176_vm0 = vmmov 0   ;;  %vm50_vm1 = vcmask 261120   ;;  %s252_s1 = inlined_call_operand.vmem [shape: bf16[32,32], index: 1, kind: input, shape index: {}]   ;;  %s253_s0 = inlined_call_operand.vmem [shape: f32[16,32], index: 0, kind: input, shape index: {}]   ;;  %s254_s2 = inlined_call_operand.vmem [shape: f32[1,32], index: 2, kind: input, shape index: {}]   ;;  %s255_s3 = inlined_call_operand.vmem [shape: f32[16,32], index: 3, kind: input, shape index: {}]   ;;  %s256_s4 = inlined_call_operand.vmem [shape: f32[1,32], index: 4, kind: input, shape index: {}]   ;;  %s257_s5 = inlined_call_operand.vmem [shape: f32[1,32], index: 5, kind: input, shape index: {}]   ;;  %s258_s6 = inlined_call_operand.vmem [shape: f32[16,32], index: 6, kind: output, shape index: {}]  }
   0x1   :  { %159 = vmatprep.subr.bf16.mxu0 %v175_v0  ;;  %v169_v1 = vld [vmem:[%s252_s1] sm:$0xff]   ;;  %163 = vmatprep.mubr.msk.bf16.mxu0 %vm176_vm0, %v175_v0  ;;  %v170_v2 = vld [vmem:[%s252_s1 + $0x8] sm:$0xff]  }
   0x2   :  { %160 = vmatpush3.bf16.msra.mxu0 %v169_v1  ;;  %v24_v3 = vld [vmem:[%s253_s0] sm:$0xff]  ;;  %v25_v4 = vld [vmem:[%s253_s0 + $0x8] sm:$0xff] }
   0x3   :  { %161 = vmatprep.subr.bf16.mxu0 %v175_v0  ;;  %v26_v5 = vpack.c.bf16 %v25_v4, %v24_v3  ;;  %v150_v6 = vld [vmem:[%s254_s2] ss:$0 sm:$0xff]  ;;  %v96_v12 = vld [vmem:[%s255_s3 + $0x8] sm:$0xff] }
   0x4   :  { %v95_v8 = vld [vmem:[%s255_s3] sm:$0xff] }
   0x5   :  { %v154_v36 = vld [vmem:[%s256_s4] ss:$0 sm:$0xff] }
   0x6   :  { %162 = vmatpush3.bf16.msra.mxu0 %v170_v2  ;;  %v155_v38 = vld [vmem:[%s257_s5] ss:$0 sm:$0xff] }
   0x9   :  { %164 = vmatmul.mubr.msk.bf16.vlgmr.msra.gmra.mrb[0].mxu0 %vm50_vm1, %v26_v5 }
  0xdc   :  { %v88_v7 = vpop.f32.mrb[0].mxu0 }
  0xdd   :  { %v89_v9 = vadd.f32 %v150_v6, %v88_v7  ;;  %v165_v10 = vpop.f32.mrb[1].mxu0 }
  0xde   :  { %v91_v11 = vpop.f32.mrb[2].mxu0 }
  0xdf   :  { %v92_v13 = vadd.f32 %v150_v6, %v91_v11  ;;  %v166_v14 = vpop.f32.mrb[3].mxu0  ;;  %v97_v15 = vadd.f32 %v95_v8, %v89_v9 }
  0xe1   :  { %v101_v16 = vsel %vm50_vm1, %v97_v15, 0.0  ;;  %v98_v17 = vadd.f32 %v96_v12, %v92_v13 }
  0xe2   :  { %102 = vadd.xlane.f32.xlu0 %v101_v16 }
  0xe3   :  { %v104_v18 = vsel %vm50_vm1, %v98_v17, 0.0 }
  0xe6   :  { %105 = vadd.xlane.f32.xlu0 %v104_v18 }
 0x16f   :  { %v103_v19 = vpop.xlane.xlu0 %102 }
 0x170   :  { %v108_v20 = vmul.f32 0.03125, %v103_v19 }
 0x172   :  { %v110_v21 = vsub.f32 %v97_v15, %v108_v20 }
 0x173   :  { %v106_v22 = vpop.xlane.xlu0 %105 }
 0x174   :  { %v109_v23 = vmul.f32 0.03125, %v106_v22  ;;  %v112_v24 = vmul.f32 %v110_v21, %v110_v21 }
 0x176   :  { %v111_v25 = vsub.f32 %v98_v17, %v109_v23  ;;  %v114_v26 = vsel %vm50_vm1, %v112_v24, 0.0 }
 0x177   :  { %115 = vadd.xlane.f32.xlu1 %v114_v26 }
 0x178   :  { %v113_v27 = vmul.f32 %v111_v25, %v111_v25 }
 0x17a   :  { %v117_v28 = vsel %vm50_vm1, %v113_v27, 0.0 }
 0x17b   :  { %118 = vadd.xlane.f32.xlu1 %v117_v28 }
 0x204   :  { %v116_v29 = vpop.xlane.xlu1 %115 }
 0x205   :  { %v120_v30 = vmul.f32 0.03125, %v116_v29 }
 0x207   :  { %v122_v31 = vadd.f32 1e-12, %v120_v30 }
 0x208   :  { %v119_v32 = vpop.xlane.xlu1 %118 }
 0x209   :  { %171 = vrsqrt.f32 %v122_v31  ;;  %v121_v33 = vmul.f32 0.03125, %v119_v32 }
 0x20b   :  { %v123_v34 = vadd.f32 1e-12, %v121_v33 }
 0x20d   :  { %173 = vrsqrt.f32 %v123_v34 }
 0x213   :  { %v172_v35 = vpop.eup %171 }
 0x214   :  { %v126_v37 = vmul.f32 %v172_v35, %v110_v21 }
 0x216   :  { %v134_v39 = vmul.f32 %v154_v36, %v126_v37 }
 0x217   :  { %v174_v40 = vpop.eup %173 }
 0x218   :  { %v142_v41 = vadd.f32 %v155_v38, %v134_v39  ;;  %v127_v42 = vmul.f32 %v174_v40, %v111_v25 }
 0x21a   :  { %144 = vst.msk [vmem:[%s258_s6] sm:$0xff] %vm50_vm1, %v142_v41  ;;  %v135_v43 = vmul.f32 %v154_v36, %v127_v42 }
 0x21c   :  { %v143_v44 = vadd.f32 %v155_v38, %v135_v43 }
 0x21e   :  { %145 = vst.msk [vmem:[%s258_s6 + $0x8] sm:$0xff] %vm50_vm1, %v143_v44 }

// kernel: bert_lm_forward.11
= control target key start
LH: loop header
LB: loop body
LE: loop exit
PB: predicated region body
PF: predicated region fallthrough
CT: control target
= control target key end

     0   :  { %s562_s9 = smov 0   ;;  %s623_s0 = inlined_call_operand.vmem [shape: f32[2,8,96], index: 0, kind: input, shape index: {}]   ;;  %s624_s1 = inlined_call_operand.vmem [shape: f32[2,1,8], index: 1, kind: input, shape index: {}]   ;;  %s625_s2 = inlined_call_operand.vmem [shape: f32[2,8,32], index: 2, kind: output, shape index: {}]  }
   0x1 LB: > { %s460_s10 = sadd.s32 4294967295, %s536_s9   ;;  %p464_p0 = scmp.ge.s32.totalorder %s536_s9, 1  ;;  %s536_s9 = sphi %s562_s9, %s12_s9  }
   0x2   : > { %p119_p1 = scmp.lt.s32.totalorder %s536_s9, 3 }
   0x4   : > { %p120_p2 = pnand %p464_p0, %p119_p1 }
   0x5   : > { %p142_p3 = scmp.lt.s32.totalorder (!%p120_p2), %s460_s10, 1  ;;  %v538_v0 = vmov (!%p120_p2), 0.0   ;;  %vm539_vm0 = vmmov (!%p120_p2), 0   ;;  %s540_s15 = smov (!%p120_p2), 96   ;;  %vm162_vm1 = vcmask (!%p120_p2), 130048   ;;  %v211_v5 = vlaneseq (!%p120_p2) }
   0x6   : > { %123 = sbr.rel (%p120_p2) target bundleno = 1543 (0x607), region = 28  ;;  %481 = vmatprep.subr.bf16.mxu0 (!%p120_p2), %v538_v0  ;;  %483 = vmatprep.mubr.msk.bf16.mxu0 (!%p120_p2), %vm539_vm0, %v538_v0  ;;  %s541_s16 = smov (!%p120_p2), 64   ;;  %v542_v9 = vmov (!%p120_p2), -1e+09   ;;  %vm217_vm3 = vcmask (!%p120_p2), 64512   ;;  %vm235_vm4 = vcmask (!%p120_p2), 1043456  }
   0x7   : > { %487 = vmatprep.subr.bf16.mxu1 (!%p120_p2), %v538_v0  ;;  %489 = vmatprep.mubr.msk.bf16.mxu1 (!%p120_p2), %vm539_vm0, %v538_v0  ;;  %v212_v7 = vshrl.u32 (!%p120_p2), %v211_v5, 7  ;;  %s543_s20 = smov (!%p120_p2), 80   ;;  %s544_s21 = smov (!%p120_p2), 112   ;;  %vm396_vm5 = vcmask (!%p120_p2), 261120  }
   0x8   : > { %s545_s22 = smov (!%p120_p2), 48   ;;  %s546_s23 = smov (!%p120_p2), 16  }
   0x9   : > { %v213_v8 = vsub.s32 (!%p120_p2), 0, %v212_v7 }
   0xd   : > { %s627_s10 = smov (!%p142_p3, %s460_s10), 1 }
   0xe   : > { %s465_s11 = sshll.u32 %s627_s10, 3  ;;  %s148_s19 = scalar_lea.vmem %s624_s1, %s627_s10 }
   0xf   : > { %s145_s14 = scalar_lea.vmem %s623_s0, %s465_s11  ;;  %v155_v6 = vld [vmem:[%s148_s19] sm:$0x1]  ;;  %s152_s26 = scalar_lea.vmem %s625_s2, %s465_s11 }
  0x10   : > { %v154_v1 = vld [vmem:[%s145_s14] sm:$0xff]  ;;  %vm156_vm2 = vcmp.gt.f32.partialorder %v155_v6, 0.0 }
  0x11   : > { %v584_v2 = vpack.c.bf16 %v154_v1, %v154_v1  ;;  %v157_v10 = vsel %vm156_vm2, 0.0, %v542_v9 }
  0x12   : > { %v214_v11 = vrot.slane %v157_v10, %v213_v8 }
  0x13   : > { %160 = vrot.lane.b32.xlu0 %v584_v2, %s540_s15  ;;  %230 = vrot.lane.b32.xlu1 %v584_v2, %s541_s16 }
  0x85   : > { %v161_v3 = vpop.permute.xlu0 %160  ;;  %v231_v19 = vpop.permute.xlu1 %230 }
  0x86   : > { %v167_v4 = vsel %vm162_vm1, %v161_v3, 0  ;;  %v237_v20 = vsel %vm235_vm4, %v231_v19, 0 }
  0x87   : > { %482 = vmatpush3.bf16.xpose.msra.mxu0 %v167_v4  ;;  %488 = vmatpush3.bf16.msra.mxu1 %v237_v20 }
  0x88   : > { %499 = vmatprep.subr.bf16.mxu0 %v538_v0  ;;  %493 = vmatprep.subr.bf16.mxu1 %v538_v0 }
  0x8e   : > { %484 = vmatmul.mubr.msk.bf16.vlgmr.msra.gmra.mrb[0].mxu0 %vm162_vm1, %v584_v2 }
  0x8f   : > { %501 = vmatprep.mubr.msk.bf16.mxu0 %vm539_vm0, %v538_v0 }
 0x161   : > { %v203_v12 = vpop.f32.mrb[0].mxu0 }
 0x162   : > { %v209_v13 = vmul.f32 0.25, %v203_v12  ;;  %v485_v14 = vpop.f32.mrb[1].mxu0 }
 0x163   : > { %v206_v15 = vpop.f32.mrb[2].mxu0 }
 0x164   : > { %v486_v16 = vpop.f32.mrb[3].mxu0  ;;  %v216_v17 = vadd.f32 %v214_v11, %v209_v13 }
 0x166   : > { %v218_v18 = vsel %vm217_vm3, %v216_v17, -inf }
 0x167   : > { %219 = vmax.xlane.f32.xlu0 %v218_v18 }
 0x1f4   : > { %v220_v21 = vpop.xlane.xlu0 %219 }
 0x1f5   : > { %v221_v22 = vsub.f32 %v216_v17, %v220_v21 }
 0x1f7   : > { %v222_v23 = vmul.f32 1.442695, %v221_v22 }
 0x1f9   : > { %522 = vpow2.f32 %v222_v23 }
 0x203   : > { %v523_v24 = vpop.eup %522 }
 0x204   : > { %v224_v25 = vsel %vm217_vm3, %v523_v24, 0.0 }
 0x205   : > { %225 = vadd.xlane.f32.xlu1 %v224_v25 }
 0x216   : > { %281 = vrot.lane.b32.xlu1 %v584_v2, %s543_s20 }
 0x21a   : > { %279 = vrot.lane.b32.xlu1 %v584_v2, %s544_s21 }
 0x292   : > { %v226_v26 = vpop.xlane.xlu1 %225 }
 0x293   : > { %524 = vrcp.f32 %v226_v26 }
 0x296   : > { %v282_v28 = vpop.permute.xlu1 %281 }
 0x297   : > { %v287_v30 = vsel %vm162_vm1, %v282_v28, 0 }
 0x29a   : > { %v280_v32 = vpop.permute.xlu1 %279 }
 0x29d   : > { %v525_v27 = vpop.eup %524 }
 0x29e   : > { %v228_v29 = vmul.f32 %v525_v27, %v523_v24 }
 0x2a0   : > { %v229_v31 = vpack.c.bf16 %v228_v29, %v228_v29 }
 0x2a2   : > { %490 = vmatmul.mubr.msk.bf16.vlgmr.msra.gmra.mrb[0].mxu1 %vm217_vm3, %v229_v31 }
 0x2a3   : > { %494 = vmatpush3.bf16.xpose.msra.mxu1 %v287_v30  ;;  %495 = vmatprep.mubr.msk.bf16.mxu1 %vm539_vm0, %v538_v0 }
 0x2aa   : > { %496 = vmatmul.mubr.msk.bf16.vlgmr.msra.gmra.mrb[4].mxu1 %vm162_vm1, %v280_v32 }
 0x375   : > { %v273_v33 = vpop.f32.mrb[0].mxu1 }
 0x376   : > { %v491_v34 = vpop.f32.mrb[1].mxu1 }
 0x377   : > { %v276_v35 = vpop.f32.mrb[2].mxu1 }
 0x378   : > { %v492_v36 = vpop.f32.mrb[3].mxu1 }
 0x37d   : > { %v323_v37 = vpop.f32.mrb[4].mxu1 }
 0x37e   : > { %v329_v38 = vmul.f32 0.25, %v323_v37  ;;  %v497_v39 = vpop.f32.mrb[5].mxu1 }
 0x37f   : > { %v326_v40 = vpop.f32.mrb[6].mxu1 }
 0x380   : > { %v498_v41 = vpop.f32.mrb[7].mxu1  ;;  %v330_v42 = vadd.f32 %v329_v38, %v214_v11 }
 0x382   : > { %v331_v43 = vsel %vm217_vm3, %v330_v42, -inf }
 0x383   : > { %332 = vmax.xlane.f32.xlu1 %v331_v43 }
 0x410   : > { %v333_v44 = vpop.xlane.xlu1 %332 }
 0x411   : > { %v334_v45 = vsub.f32 %v330_v42, %v333_v44 }
 0x413   : > { %v335_v46 = vmul.f32 1.442695, %v334_v45 }
 0x415   : > { %526 = vpow2.f32 %v335_v46 }
 0x41f   : > { %v527_v47 = vpop.eup %526 }
 0x420   : > { %v337_v48 = vsel %vm217_vm3, %v527_v47, 0.0 }
 0x421   : > { %338 = vadd.xlane.f32.xlu0 %v337_v48 }
 0x437   : > { %343 = vrot.lane.b32.xlu0 %v584_v2, %s545_s22 }
 0x4ae   : > { %v339_v49 = vpop.xlane.xlu0 %338 }
 0x4af   : > { %528 = vrcp.f32 %v339_v49 }
 0x4b2   : > { %v344_v50 = vpop.permute.xlu0 %343 }
 0x4b3   : > { %v349_v51 = vsel %vm235_vm4, %v344_v50, 0 }
 0x4b4   : > { %500 = vmatpush3.bf16.msra.mxu0 %v349_v51 }
 0x4b9   : > { %v529_v52 = vpop.eup %528 }
 0x4ba   : > { %v341_v53 = vmul.f32 %v529_v52, %v527_v47 }
 0x4bc   : > { %v342_v54 = vpack.c.bf16 %v341_v53, %v341_v53 }
 0x4be   : > { %502 = vmatmul.mubr.msk.bf16.vlgmr.msra.gmra.mrb[4].mxu0 %vm217_vm3, %v342_v54 }
 0x591   : > { %v385_v55 = vpop.f32.mrb[4].mxu0 }
 0x592   : > { %392 = vrot.lane.b32.xlu0 %v385_v55, %s546_s23  ;;  %v503_v56 = vpop.f32.mrb[5].mxu0 }
 0x593   : > { %v388_v57 = vpop.f32.mrb[6].mxu0 }
 0x594   : > { %v504_v58 = vpop.f32.mrb[7].mxu0 }
 0x604   : > { %v393_v59 = vpop.permute.xlu0 %392 }
 0x605   : > { %v395_v60 = vsel %vm162_vm1, %v273_v33, %v393_v59 }
 0x606   : > { %397 = vst.msk [vmem:[%s152_s26] sm:$0xff] %vm396_vm5, %v395_v60 }
 0x607 PF: > { %s12_s9 = sadd.s32 1, %s536_s9  }
 0x608   : > { %p9_p4 = scmp.ge.s32.totalorder %s12_s9, 4  }
 0x60a   :  { %11 = sbr.rel (!%p9_p4) target bundleno = 1 (0x1), region = 61 }

// kernel: bert_lm_forward.13
= control target key start
LH: loop header
LB: loop body
LE: loop exit
PB: predicated region body
PF: predicated region fallthrough
CT: control target
= control target key end

     0   :  { %vm31_vm0 = vcmask 261120   ;;  %v332_v0 = vmov 0.0   ;;  %vm333_vm1 = vmmov 0   ;;  %vm158_vm2 = vcmask 523264   ;;  %s435_s1 = inlined_call_operand.vmem [shape: bf16[32,64], index: 1, kind: input, shape index: {}]   ;;  %s436_s0 = inlined_call_operand.vmem [shape: f32[16,32], index: 0, kind: input, shape index: {}]   ;;  %s437_s3 = inlined_call_operand.vmem [shape: bf16[64,32], index: 3, kind: input, shape index: {}]   ;;  %s438_s2 = inlined_call_operand.vmem [shape: f32[1,64], index: 2, kind: input, shape index: {}]   ;;  %s439_s4 = inlined_call_operand.vmem [shape: f32[1,32], index: 4, kind: input, shape index: {}]   ;;  %s440_s5 = inlined_call_operand.vmem [shape: f32[1,32], index: 5, kind: input, shape index: {}]   ;;  %s441_s6 = inlined_call_operand.vmem [shape: f32[1,32], index: 6, kind: input, shape index: {}]   ;;  %s442_s7 = inlined_call_operand.vmem [shape: f32[16,32], index: 7, kind: output, shape index: {}]  }
   0x1   :  { %296 = vmatprep.subr.bf16.mxu0 %v332_v0  ;;  %v318_v1 = vld [vmem:[%s435_s1] sm:$0xff]   ;;  %300 = vmatprep.mubr.msk.bf16.mxu0 %vm333_vm1, %v332_v0  ;;  %32 = vst.msk [vmem:[#allocation2] sm:$0xff] %vm31_vm0, %v332_v0  ;;  %33 = vst.msk [vmem:[#allocation2 + $0x8] sm:$0xff] %vm31_vm0, %v332_v0  ;;  %v319_v2 = vld [vmem:[%s435_s1 + $0x8] sm:$0xff]  }
   0x2   :  { %304 = vmatprep.subr.bf16.mxu1 %v332_v0  ;;  %312 = vmatprep.mubr.msk.bf16.mxu1 %vm333_vm1, %v332_v0  ;;  %v385_v3 = vld [vmem:[%s436_s0] sm:$0xff]  ;;  %v390_v4 = vld [vmem:[%s436_s0 + $0x8] sm:$0xff]  ;;  %v322_v8 = vld [vmem:[%s437_s3 + $0x10] sm:$0xff]  }
   0x3   :  { %297 = vmatpush3.bf16.msra.mxu0 %v318_v1  ;;  %v36_v5 = vpack.c.bf16 %v390_v4, %v385_v3  ;;  %v320_v6 = vld [vmem:[%s437_s3] sm:$0xff]   ;;  %v321_v7 = vld [vmem:[%s437_s3 + $0x8] sm:$0xff]   ;;  %v323_v9 = vld [vmem:[%s437_s3 + $0x18] sm:$0xff]  }
   0x4   :  { %298 = vmatprep.subr.bf16.mxu0 %v332_v0  ;;  %305 = vmatpush3.bf16.msra.mxu1 %v320_v6  ;;  %v276_v10 = vld [vmem:[%s438_s2] ss:$0 sm:$0xff] }
   0x5   :  { %306 = vmatprep.subr.bf16.mxu1 %v332_v0  ;;  %v285_v44 = vld [vmem:[%s439_s4] ss:$0 sm:$0xff] }
   0x6   :  { %v286_v6 = vld [vmem:[%s440_s5] ss:$0 sm:$0xff] }
   0x7   :  { %299 = vmatpush3.bf16.msra.mxu0 %v319_v2 }
   0x8   :  { %307 = vmatpush3.bf16.msra.mxu1 %v321_v7  ;;  %v123_v36 = vld [vmem:[#allocation2] sm:$0xff]  ;;  %v124_v38 = vld [vmem:[#allocation2 + $0x8] sm:$0xff] }
   0x9   :  { %308 = vmatprep.subr.bf16.mxu1 %v332_v0 }
   0xa   :  { %301 = vmatmul.mubr.msk.bf16.vlgmr.msra.gmra.mrb[0].mxu0 %vm31_vm0, %v36_v5 }
   0xc   :  { %309 = vmatpush3.bf16.msra.mxu1 %v322_v8  ;;  %v287_v8 = vld [vmem:[%s441_s6] ss:$0 sm:$0xff] }
   0xd   :  { %310 = vmatprep.subr.bf16.mxu1 %v332_v0 }
  0x10   :  { %311 = vmatpush3.bf16.msra.mxu1 %v323_v9 }
  0xdd   :  { %v98_v11 = vpop.f32.mrb[0].mxu0 }
  0xde   :  { %v99_v12 = vadd.f32 %v276_v10, %v98_v11  ;;  %v302_v13 = vpop.f32.mrb[1].mxu0 }
  0xdf   :  { %v101_v14 = vpop.f32.mrb[2].mxu0 }
  0xe0   :  { %v107_v15 = vmul.f32 0.044715, %v99_v12  ;;  %v102_v16 = vadd.f32 %v276_v10, %v101_v14  ;;  %v303_v17 = vpop.f32.mrb[3].mxu0  ;;  %v105_v30 = vmul.f32 0.5, %v99_v12 }
  0xe2   :  { %v109_v18 = vmul.f32 %v107_v15, %v99_v12  ;;  %v108_v19 = vmul.f32 0.044715, %v102_v16  ;;  %v106_v31 = vmul.f32 0.5, %v102_v16 }
  0xe4   :  { %v111_v20 = vmul.f32 %v109_v18, %v99_v12  ;;  %v110_v21 = vmul.f32 %v108_v19, %v102_v16 }
  0xe6   :  { %v113_v22 = vadd.f32 %v111_v20, %v99_v12  ;;  %v112_v23 = vmul.f32 %v110_v21, %v102_v16 }
  0xe8   :  { %v115_v24 = vmul.f32 0.7978846, %v113_v22  ;;  %v114_v25 = vadd.f32 %v112_v23, %v102_v16 }
  0xea   :  { %324 = vtanh.f32 %v115_v24  ;;  %v116_v26 = vmul.f32 0.7978846, %v114_v25 }
  0xec   :  { %326 = vtanh.f32 %v116_v26 }
  0xf4   :  { %v325_v27 = vpop.eup %324 }
  0xf5   :  { %v119_v28 = vadd.f32 1.0, %v325_v27 }
  0xf6   :  { %v327_v29 = vpop.eup %326 }
  0xf7   :  { %v120_v32 = vadd.f32 1.0, %v327_v29  ;;  %v121_v33 = vmul.f32 %v119_v28, %v105_v30 }
  0xf9   :  { %v122_v34 = vmul.f32 %v120_v32, %v106_v31 }
  0xfb   :  { %v125_v35 = vpack.c.bf16 %v122_v34, %v121_v33 }
  0xfd   :  { %313 = vmatmul.mubr.msk.bf16.vlgmr.msra.gmra.mrb[0].mxu1 %vm158_vm2, %v125_v35 }
 0x1d0   :  { %v196_v37 = vpop.f32.mrb[0].mxu1 }
 0x1d1   :  { %v203_v39 = vadd.f32 %v196_v37, %v123_v36  ;;  %v314_v40 = vpop.f32.mrb[1].mxu1 }
 0x1d2   :  { %v199_v41 = vpop.f32.mrb[2].mxu1 }
 0x1d3   :  { %205 = vst.msk [vmem:[#allocation2] sm:$0xff] %vm31_vm0, %v203_v39  ;;  %v204_v42 = vadd.f32 %v199_v41, %v124_v38  ;;  %v315_v43 = vpop.f32.mrb[3].mxu1 }
 0x1d5   :  { %206 = vst.msk [vmem:[#allocation2 + $0x8] sm:$0xff] %vm31_vm0, %v204_v42 }
 0x1da   :  { %v210_v45 = vld [vmem:[#allocation2] sm:$0xff] }
 0x1db   :  { %v219_v46 = vadd.f32 %v285_v44, %v210_v45 }
 0x1dc   :  { %v211_v47 = vld [vmem:[#allocation2 + $0x8] sm:$0xff] }
 0x1dd   :  { %v223_v48 = vadd.f32 %v219_v46, %v385_v3  ;;  %v220_v49 = vadd.f32 %v285_v44, %v211_v47 }
 0x1df   :  { %v227_v50 = vsel %vm31_vm0, %v223_v48, 0.0  ;;  %v224_v51 = vadd.f32 %v220_v49, %v390_v4 }
 0x1e0   :  { %228 = vadd.xlane.f32.xlu0 %v227_v50 }
 0x1e1   :  { %v230_v52 = vsel %vm31_vm0, %v224_v51, 0.0 }
 0x1e4   :  { %231 = vadd.xlane.f32.xlu0 %v230_v52 }
 0x26d   :  { %v229_v53 = vpop.xlane.xlu0 %228 }
 0x26e   :  { %v234_v54 = vmul.f32 0.03125, %v229_v53 }
 0x270   :  { %v236_v55 = vsub.f32 %v223_v48, %v234_v54 }
 0x271   :  { %v232_v56 = vpop.xlane.xlu0 %231 }
 0x272   :  { %v235_v57 = vmul.f32 0.03125, %v232_v56  ;;  %v238_v58 = vmul.f32 %v236_v55, %v236_v55 }
 0x274   :  { %v237_v59 = vsub.f32 %v224_v51, %v235_v57  ;;  %v240_v60 = vsel %vm31_vm0, %v238_v58, 0.0 }
 0x275   :  { %241 = vadd.xlane.f32.xlu1 %v240_v60 }
 0x276   :  { %v239_v61 = vmul.f32 %v237_v59, %v237_v59 }
 0x278   :  { %v243_v62 = vsel %vm31_vm0, %v239_v61, 0.0 }
 0x279   :  { %244 = vadd.xlane.f32.xlu1 %v243_v62 }
 0x302   :  { %v242_v63 = vpop.xlane.xlu1 %241 }
 0x303   :  { %v246_v0 = vmul.f32 0.03125, %v242_v63 }
 0x305   :  { %v248_v1 = vadd.f32 1e-12, %v246_v0 }
 0x306   :  { %v245_v2 = vpop.xlane.xlu1 %244 }
 0x307   :  { %328 = vrsqrt.f32 %v248_v1  ;;  %v247_v3 = vmul.f32 0.03125, %v245_v2 }
 0x309   :  { %v249_v4 = vadd.f32 1e-12, %v247_v3 }
 0x30b   :  { %330 = vrsqrt.f32 %v249_v4 }
 0x311   :  { %v329_v5 = vpop.eup %328 }
 0x312   :  { %v252_v7 = vmul.f32 %v329_v5, %v236_v55 }
 0x314   :  { %v260_v9 = vmul.f32 %v286_v6, %v252_v7 }
 0x315   :  { %v331_v10 = vpop.eup %330 }
 0x316   :  { %v268_v11 = vadd.f32 %v287_v8, %v260_v9  ;;  %v253_v12 = vmul.f32 %v331_v10, %v237_v59 }
 0x318   :  { %270 = vst.msk [vmem:[%s442_s7] sm:$0xff] %vm31_vm0, %v268_v11  ;;  %v261_v13 = vmul.f32 %v286_v6, %v253_v12 }
 0x31a   :  { %v269_v14 = vadd.f32 %v287_v8, %v261_v13 }
 0x31c   :  { %271 = vst.msk [vmem:[%s442_s7 + $0x8] sm:$0xff] %vm31_vm0, %v269_v14 }

// kernel: bert_lm_forward.19
= control target key start
LH: loop header
LB: loop body
LE: loop exit
PB: predicated region body
PF: predicated region fallthrough
CT: control target
= control target key end

     0   :  { %s119_s0 = inlined_call_operand.vmem [shape: f32[16,100], index: 0, kind: input, shape index: {}]   ;;  %s120_s1 = inlined_call_operand.vmem [shape: f32[16,1], index: 1, kind: input, shape index: {}]   ;;  %s121_s2 = inlined_call_operand.hbm [shape: f32[16,100], index: 2, kind: output, shape index: {}]  }
   0x1   :  { %v14_v0 = vld [vmem:[%s120_s1] sm:$0xff] }
   0x2   :  { %7 = vsyncpa [#allocation3], 0  ;;  %v76_v1 = vmov 0   ;;  %v15_v2 = vld [vmem:[%s120_s1 + $0x8] sm:$0xff]  ;;  %v12_v3 = vld [vmem:[%s119_s0] sm:$0xff]  ;;  %vm28_vm0 = vcmask 818176  }
   0x3   :  { %51 = vset.pattern.permute.xlu0 %v76_v1  ;;  %s77_s15 = smov [#allocation2]   ;;  %v13_v6 = vld [vmem:[%s119_s0 + $0x8] sm:$0xff] }
   0x4   :  { %18 = vperm.xlu0 %51, %v14_v0   ;;  %s36_s16 = sshll.u32 %s77_s15, 4  ;;  %s37_s16 = int_to_ptr.vmem [resolvable:$true] %s36_s16 }
   0x5   :  { %s52_s1 = scalar_lea.vmem %s37_s16, 256  ;;  %p57_p1 = scmp.lt.s32.totalorder %s37_s16, %s37_s16 }
   0x6   :  { %p53_p0 = scmp.ne.s32.totalorder %s37_s16, %s52_s1  ;;  %p58_p2 = scmp.lt.s32.totalorder %s52_s1, %s52_s1 }
   0x8   :  { %23 = vperm.xlu0 %51, %v15_v2   ;;  %p59_p3 = por %p58_p2, %p57_p1 }
   0xa   :  { %p60_p4 = pnand %p59_p3, %p53_p0 }
  0x83   :  { %v19_v4 = vpop.permute.xlu0 %18 }
  0x84   :  { %v26_v5 = vsub.f32 %v12_v3, %v19_v4 }
  0x86   :  { %29 = vst.msk [vmem:[#allocation2] sm:$0xff] %vm28_vm0, %v26_v5 }
  0x87   :  { %v24_v7 = vpop.permute.xlu0 %23 }
  0x88   :  { %v27_v8 = vsub.f32 %v13_v6, %v24_v7 }
  0x8a   :  { %30 = vst.msk [vmem:[#allocation2 + $0x8] sm:$0xff] %vm28_vm0, %v27_v8 }
  0x8b   :  { %63 = shalt.err (!%p60_p4)
}
  0x8c   :  { %s64_s21 = scalar_lea.hbm %s121_s2, 256 }
  0x8d   :  { %p65_p5 = scmp.ne.s32.totalorder %s121_s2, %s64_s21  ;;  %p68_p6 = scmp.lt.u32.totalorder %s64_s21, %s121_s2 }
  0x8f   :  { %p70_p7 = pnand %p68_p6, %p65_p5 }
  0x91   :  { %73 = shalt.err (!%p70_p7)
}
  0x92   :  { %s78_s25 = smov 128   ;;  %s79_s26 = smov 8  }
  0x93   :  { %42 = dma.vmem_to_hbm [thread:$0]  %s37_s16, 256, %s121_s2, [#allocation3], %s78_s25, %s78_s25, %s79_s26  }
  0x94   :  { %74 = dma.done.wait [#allocation3], 256  }
  0x95   :  { %75 = vsyncadd [#allocation3], 4294967040 }
  0x96   :  { %46 = vsyncpa [#allocation3], 1 }

// kernel: bert_lm_forward.18
= control target key start
LH: loop header
LB: loop body
LE: loop exit
PB: predicated region body
PF: predicated region fallthrough
CT: control target
= control target key end

     0   :  { %vm31_vm0 = vcmask 818176   ;;  %v228_v0 = vmov 0.0   ;;  %vm229_vm1 = vmmov 0   ;;  %vm55_vm2 = vcmask 261120   ;;  %s304_s1 = inlined_call_operand.vmem [shape: bf16[32,100], index: 1, kind: input, shape index: {}]   ;;  %s305_s0 = inlined_call_operand.vmem [shape: f32[16,32], index: 0, kind: input, shape index: {}]   ;;  %s306_s2 = inlined_call_operand.vmem [shape: f32[1,100], index: 2, kind: input, shape index: {}]   ;;  %s307_s3 = inlined_call_operand.vmem [shape: f32[16,100], index: 3, kind: output, shape index: {0}]   ;;  %s308_s4 = inlined_call_operand.vmem [shape: f32[16,1], index: 4, kind: output, shape index: {1}]  }
   0x1   :  { %200 = vmatprep.subr.bf16.mxu0 %v228_v0  ;;  %v214_v1 = vld [vmem:[%s304_s1] sm:$0xff]   ;;  %204 = vmatprep.mubr.msk.bf16.mxu0 %vm229_vm1, %v228_v0  ;;  %32 = vst.msk [vmem:[#allocation2] sm:$0xff] %vm31_vm0, %v228_v0  ;;  %33 = vst.msk [vmem:[#allocation2 + $0x8] sm:$0xff] %vm31_vm0, %v228_v0  ;;  %v215_v2 = vld [vmem:[%s304_s1 + $0x8] sm:$0xff]   ;;  %vm23_vm3 = vcmask 7168   ;;  %v230_v6 = vmov -inf  }
   0x2   :  { %201 = vmatpush3.bf16.msra.mxu0 %v214_v1  ;;  %v36_v3 = vld [vmem:[%s305_s0] sm:$0xff]  ;;  %v37_v4 = vld [vmem:[%s305_s0 + $0x8] sm:$0xff]  ;;  %24 = vst.msk [vmem:[#allocation3] sm:$0xff] %vm23_vm3, %v230_v6  ;;  %25 = vst.msk [vmem:[#allocation3 + $0x8] sm:$0xff] %vm23_vm3, %v230_v6  ;;  %v231_v22 = vmov 0  }
   0x3   :  { %202 = vmatprep.subr.bf16.mxu0 %v228_v0  ;;  %v38_v5 = vpack.c.bf16 %v37_v4, %v36_v3  ;;  %26 = vst.msk [vmem:[#allocation4] sm:$0xff] %vm23_vm3, %v228_v0  ;;  %27 = vst.msk [vmem:[#allocation4 + $0x8] sm:$0xff] %vm23_vm3, %v228_v0  ;;  %v196_v15 = vld [vmem:[%s306_s2] ss:$0 sm:$0xff]  ;;  %212 = vset.pattern.permute.xlu1 %v231_v22 }
   0x4   :  { %213 = vset.pattern.permute.xlu0 %v231_v22 }
   0x6   :  { %203 = vmatpush3.bf16.msra.mxu0 %v215_v2 }
   0x8   :  { %v34_v7 = vld [vmem:[#allocation2] sm:$0xff]  ;;  %v35_v9 = vld [vmem:[#allocation2 + $0x8] sm:$0xff] }
   0x9   :  { %205 = vmatmul.mubr.msk.bf16.vlgmr.msra.gmra.mrb[0].mxu0 %vm55_vm2, %v38_v5  ;;  %v121_v23 = vld [vmem:[#allocation3] sm:$0xff]  ;;  %v122_v26 = vld [vmem:[#allocation3 + $0x8] sm:$0xff] }
   0xa   :  { %v131_v44 = vld [vmem:[#allocation4] sm:$0xff]  ;;  %v132_v48 = vld [vmem:[#allocation4 + $0x8] sm:$0xff] }
  0xdc   :  { %v93_v8 = vpop.f32.mrb[0].mxu0 }
  0xdd   :  { %v100_v10 = vadd.f32 %v93_v8, %v34_v7  ;;  %v206_v11 = vpop.f32.mrb[1].mxu0 }
  0xde   :  { %v96_v12 = vpop.f32.mrb[2].mxu0 }
  0xdf   :  { %103 = vst.msk [vmem:[#allocation2] sm:$0xff] %vm31_vm0, %v100_v10  ;;  %v101_v13 = vadd.f32 %v96_v12, %v35_v9  ;;  %v207_v14 = vpop.f32.mrb[3].mxu0 }
  0xe1   :  { %104 = vst.msk [vmem:[#allocation2 + $0x8] sm:$0xff] %vm31_vm0, %v101_v13 }
  0xe6   :  { %v108_v16 = vld [vmem:[#allocation2] sm:$0xff] }
  0xe7   :  { %v117_v17 = vadd.f32 %v196_v15, %v108_v16 }
  0xe8   :  { %v109_v18 = vld [vmem:[#allocation2 + $0x8] sm:$0xff] }
  0xe9   :  { %v123_v19 = vsel %vm31_vm0, %v117_v17, -inf  ;;  %119 = vst.msk [vmem:[%s307_s3] sm:$0xff] %vm31_vm0, %v117_v17  ;;  %v118_v20 = vadd.f32 %v196_v15, %v109_v18 }
  0xea   :  { %124 = vmax.xlane.f32.xlu0 %v123_v19 }
  0xeb   :  { %120 = vst.msk [vmem:[%s307_s3 + $0x8] sm:$0xff] %vm31_vm0, %v118_v20  ;;  %v126_v21 = vsel %vm31_vm0, %v118_v20, -inf }
  0xee   :  { %127 = vmax.xlane.f32.xlu0 %v126_v21 }
 0x177   :  { %v125_v24 = vpop.xlane.xlu0 %124 }
 0x178   :  { %v129_v25 = vmax.f32 %v121_v23, %v125_v24 }
 0x17a   :  { %v133_v27 = vsub.f32 %v121_v23, %v129_v25  ;;  %168 = vst.msk [vmem:[#allocation3] sm:$0xff] %vm23_vm3, %v129_v25  ;;  %143 = vperm.xlu1 %212, %v129_v25  }
 0x17b   :  { %v128_v28 = vpop.xlane.xlu0 %127 }
 0x17c   :  { %v130_v29 = vmax.f32 %v122_v26, %v128_v28  ;;  %v135_v41 = vmul.f32 1.442695, %v133_v27 }
 0x17e   :  { %v134_v30 = vsub.f32 %v122_v26, %v130_v29  ;;  %169 = vst.msk [vmem:[#allocation3 + $0x8] sm:$0xff] %vm23_vm3, %v130_v29  ;;  %148 = vperm.xlu1 %212, %v130_v29  }
 0x180   :  { %v137_v42 = vmul.f32 1.442695, %v134_v30 }
 0x181   :  { %v172_v57 = vld [vmem:[#allocation3] sm:$0xff] }
 0x185   :  { %v173_v61 = vld [vmem:[#allocation3 + $0x8] sm:$0xff] }
 0x1f9   :  { %v144_v31 = vpop.permute.xlu1 %143 }
 0x1fa   :  { %v151_v32 = vsub.f32 %v117_v17, %v144_v31 }
 0x1fc   :  { %v153_v33 = vmul.f32 1.442695, %v151_v32 }
 0x1fd   :  { %v149_v34 = vpop.permute.xlu1 %148 }
 0x1fe   :  { %216 = vpow2.f32 %v153_v33  ;;  %v152_v35 = vsub.f32 %v118_v20, %v149_v34 }
 0x200   :  { %v155_v36 = vmul.f32 1.442695, %v152_v35 }
 0x202   :  { %218 = vpow2.f32 %v155_v36 }
 0x203   :  { %220 = vpow2.f32 %v135_v41 }
 0x204   :  { %222 = vpow2.f32 %v137_v42 }
 0x208   :  { %v217_v37 = vpop.eup %216 }
 0x209   :  { %v157_v38 = vsel %vm31_vm0, %v217_v37, 0.0 }
 0x20a   :  { %158 = vadd.xlane.f32.xlu0 %v157_v38 }
 0x20c   :  { %v219_v39 = vpop.eup %218 }
 0x20d   :  { %v160_v40 = vsel %vm31_vm0, %v219_v39, 0.0  ;;  %v221_v43 = vpop.eup %220 }
 0x20e   :  { %161 = vadd.xlane.f32.xlu1 %v160_v40  ;;  %v139_v45 = vmul.f32 %v221_v43, %v131_v44  ;;  %v223_v46 = vpop.eup %222 }
 0x20f   :  { %v140_v50 = vmul.f32 %v223_v46, %v132_v48 }
 0x297   :  { %v159_v47 = vpop.xlane.xlu0 %158 }
 0x298   :  { %v163_v49 = vadd.f32 %v159_v47, %v139_v45 }
 0x29a   :  { %166 = vst.msk [vmem:[#allocation4] sm:$0xff] %vm23_vm3, %v163_v49 }
 0x29b   :  { %v162_v51 = vpop.xlane.xlu1 %161 }
 0x29c   :  { %v164_v52 = vadd.f32 %v162_v51, %v140_v50 }
 0x29e   :  { %167 = vst.msk [vmem:[#allocation4 + $0x8] sm:$0xff] %vm23_vm3, %v164_v52 }
 0x2a1   :  { %v174_v53 = vld [vmem:[#allocation4] sm:$0xff] }
 0x2a2   :  { %224 = vlog2.f32 %v174_v53 }
 0x2a5   :  { %v175_v54 = vld [vmem:[#allocation4 + $0x8] sm:$0xff] }
 0x2a6   :  { %226 = vlog2.f32 %v175_v54 }
 0x2ac   :  { %v225_v55 = vpop.eup %224 }
 0x2ad   :  { %v177_v56 = vmul.f32 0.6931472, %v225_v55 }
 0x2af   :  { %v180_v58 = vadd.f32 %v177_v56, %v172_v57 }
 0x2b0   :  { %v227_v59 = vpop.eup %226 }
 0x2b1   :  { %183 = vst.msk [vmem:[%s308_s4] sm:$0xff] %vm23_vm3, %v180_v58  ;;  %v179_v60 = vmul.f32 0.6931472, %v227_v59 }
 0x2b3   :  { %v181_v62 = vadd.f32 %v179_v60, %v173_v61 }
 0x2b5   :  { %184 = vst.msk [vmem:[%s308_s4 + $0x8] sm:$0xff] %vm23_vm3, %v181_v62 }

</bundles_post_ra>
